<compile_context>
chip_gen: v5e
topology: v5e:2x2
jax: 0.10.0
libtpu: 0.0.40
codegen_flags: <defaults>
</compile_context>

<pallas_src>
import jax
import jax.numpy as jnp
from jax.experimental import pallas as pl
from jax.experimental.pallas import tpu as pltpu

VOCAB_SIZE = 128
EMBEDDING_DIM = 16
CONTEXT_SIZE = 2
HIDDEN = 128
FUSED_IN = CONTEXT_SIZE * VOCAB_SIZE  # 256 = contraction depth of fused matmul


def _round_up(x, m):
    return ((x + m - 1) // m) * m


def ngram_kernel(idx_ref, w1f_ref, b1_ref, w2_ref, b2_ref, out_ref):
    """One grid step: TB contexts -> (TB, VOCAB) log-probs.

    idx_ref : (TB, C) int32, ids already offset by c*VOCAB per context column.
    w1f_ref : (C*V, HIDDEN) bf16 fused (embedding @ linear1) weight.
    w2_ref  : (HIDDEN, VOCAB) bf16.
    b1/b2   : (1, HIDDEN)/(1, VOCAB) f32 (added after f32 accumulation).
    """
    idx = idx_ref[...]                                            # (TB, C)
    iota = jax.lax.broadcasted_iota(jnp.int32, (1, FUSED_IN), 1)  # (1, C*V)

    # Single multi-hot row per context (disjoint ranges -> OR is exact).
    hot = None
    for c in range(CONTEXT_SIZE):
        m = idx[:, c:c + 1] == iota                               # (TB, C*V) bool
        hot = m if hot is None else (hot | m)
    onehot = hot.astype(jnp.bfloat16)                             # exact 0/1

    # Fused embedding-gather + linear1 as one full-width bf16 MXU matmul.
    h = jnp.dot(onehot, w1f_ref[...], preferred_element_type=jnp.float32)
    h = jnp.maximum(h + b1_ref[...], 0.0)                         # (TB, HIDDEN)

    # linear2 (bf16 operands, f32 accumulation).
    logits = jnp.dot(h.astype(jnp.bfloat16), w2_ref[...],
                     preferred_element_type=jnp.float32)
    logits = logits + b2_ref[...]                                 # (TB, VOCAB)

    # log_softmax along dim=1 (numerically stable). max/sum -> XLU, exp/log -> EUP.
    mx = jnp.max(logits, axis=-1, keepdims=True)
    shifted = logits - mx
    lse = jnp.log(jnp.sum(jnp.exp(shifted), axis=-1, keepdims=True))
    out_ref[...] = (shifted - lse).astype(out_ref.dtype)


def ngram_forward(indices, emb_table, w1, b1, w2, b2, *,
                  block_b=1024, out_dtype=jnp.float32):
    """Batched NGramLanguageModeler forward.

    indices: (B, C) int32 token ids, or (C,) for the single-context PyTorch
    module semantics. Returns (B, VOCAB) log-probs ((1, VOCAB) for (C,)).
    """
    indices = jnp.asarray(indices, jnp.int32)
    if indices.ndim == 1:
        indices = indices[None, :]
    B, C = indices.shape
    assert C == CONTEXT_SIZE

    # --- wrapper-side weight fusion: W1f[c*V + t, :] = emb_table[t] @ w1[c*D:(c+1)*D, :]
    w1 = jnp.asarray(w1, jnp.float32)
    w1f = jnp.concatenate(
        [emb_table.astype(jnp.float32) @ w1[c * EMBEDDING_DIM:(c + 1) * EMBEDDING_DIM, :]
         for c in range(CONTEXT_SIZE)], axis=0).astype(jnp.bfloat16)   # (C*V, H)
    w2_bf = jnp.asarray(w2, jnp.bfloat16)                              # (H, V)
    b1 = jnp.asarray(b1, jnp.float32).reshape(1, HIDDEN)
    b2 = jnp.asarray(b2, jnp.float32).reshape(1, VOCAB_SIZE)

    # --- wrapper-side id offsetting: context column c compares against [c*V, (c+1)*V)
    offsets = (jnp.arange(CONTEXT_SIZE, dtype=jnp.int32) * VOCAB_SIZE)[None, :]
    indices = indices + offsets

    # Batch tile: multiple of 8 sublanes; >=2 grid steps when B > 8 so the
    # parallel batch axis shards across v7x's 2 TensorCores.
    if B <= 8:
        tb = _round_up(B, 8)
    else:
        tb = min(block_b, _round_up(pl.cdiv(B, 2), 8))
    b_pad = _round_up(B, tb)
    if b_pad != B:
        indices = jnp.pad(indices, ((0, b_pad - B), (0, 0)))

    flops_per_row = 2 * FUSED_IN * HIDDEN + 2 * HIDDEN * VOCAB_SIZE + 4 * VOCAB_SIZE
    cost = pl.CostEstimate(
        flops=b_pad * flops_per_row,
        transcendentals=b_pad * (VOCAB_SIZE + 1),
        bytes_accessed=(b_pad * CONTEXT_SIZE * 4
                        + b_pad * VOCAB_SIZE * jnp.dtype(out_dtype).itemsize
                        + w1f.size * 2 + w2_bf.size * 2 + b1.size * 4 + b2.size * 4),
    )

    out = pl.pallas_call(
        ngram_kernel,
        out_shape=jax.ShapeDtypeStruct((b_pad, VOCAB_SIZE), out_dtype),
        grid=(b_pad // tb,),
        in_specs=[
            # Token ids: one (tb, C) tile per grid step.
            pl.BlockSpec((tb, CONTEXT_SIZE), lambda i: (i, 0)),
            # Parameters: same block every step -> stay VMEM-resident.
            pl.BlockSpec((FUSED_IN, HIDDEN), lambda i: (0, 0)),
            pl.BlockSpec((1, HIDDEN), lambda i: (0, 0)),
            pl.BlockSpec((HIDDEN, VOCAB_SIZE), lambda i: (0, 0)),
            pl.BlockSpec((1, VOCAB_SIZE), lambda i: (0, 0)),
        ],
        out_specs=pl.BlockSpec((tb, VOCAB_SIZE), lambda i: (i, 0)),
        compiler_params=pltpu.CompilerParams(
            dimension_semantics=("parallel",)),
        cost_estimate=cost,
    )(indices, w1f, b1, w2_bf, b2)
    return out[:B]


def reference_forward(indices, emb_table, w1, b1, w2, b2):
    indices = jnp.asarray(indices, jnp.int32)
    if indices.ndim == 1:
        indices = indices[None, :]
    B = indices.shape[0]
    embeds = emb_table[indices].reshape(B, -1)
    h = jnp.maximum(embeds @ w1 + b1, 0.0)
    logits = h @ w2 + b2
    return jax.nn.log_softmax(logits, axis=-1)


if __name__ == "__main__":
    key = jax.random.PRNGKey(0)
    k_emb, k_w1, k_b1, k_w2, k_b2, k_idx, k_single = jax.random.split(key, 7)

    in1 = CONTEXT_SIZE * EMBEDDING_DIM

    # Deterministic parameter init (PyTorch-style scales, synthetic values).
    emb_table = jax.random.normal(k_emb, (VOCAB_SIZE, EMBEDDING_DIM), jnp.float32)
    w1 = jax.random.uniform(k_w1, (in1, HIDDEN), jnp.float32,
                            -1.0 / jnp.sqrt(in1), 1.0 / jnp.sqrt(in1))
    b1 = jax.random.uniform(k_b1, (1, HIDDEN), jnp.float32,
                            -1.0 / jnp.sqrt(in1), 1.0 / jnp.sqrt(in1))
    w2 = jax.random.uniform(k_w2, (HIDDEN, VOCAB_SIZE), jnp.float32,
                            -1.0 / jnp.sqrt(HIDDEN), 1.0 / jnp.sqrt(HIDDEN))
    b2 = jax.random.uniform(k_b2, (1, VOCAB_SIZE), jnp.float32,
                            -1.0 / jnp.sqrt(HIDDEN), 1.0 / jnp.sqrt(HIDDEN))

    # --- batched path: many n-gram contexts in one pallas_call ---
    B = 512
    indices = jax.random.randint(k_idx, (B, CONTEXT_SIZE), 0, VOCAB_SIZE, jnp.int32)
    out = ngram_forward(indices, emb_table, w1, b1, w2, b2)
    out = jax.block_until_ready(out)
    ref = reference_forward(indices, emb_table, w1, b1, w2, b2)
    assert out.shape == (B, VOCAB_SIZE)
    # bf16 MXU operands (f32 accumulation) -> looser tolerance than pure f32.
    assert jnp.allclose(out, ref, atol=3e-2, rtol=3e-2), (
        float(jnp.max(jnp.abs(out - ref))))

    # --- single-context path: exact PyTorch module semantics (C,) -> (1, V) ---
    single = jax.random.randint(k_single, (CONTEXT_SIZE,), 0, VOCAB_SIZE, jnp.int32)
    out1 = ngram_forward(single, emb_table, w1, b1, w2, b2)
    out1 = jax.block_until_ready(out1)
    ref1 = reference_forward(single, emb_table, w1, b1, w2, b2)
    assert out1.shape == (1, VOCAB_SIZE)
    assert jnp.allclose(out1, ref1, atol=3e-2, rtol=3e-2), (
        float(jnp.max(jnp.abs(out1 - ref1))))

    print("KERNEL_OK")
</pallas_src>

<mosaic_0001>
module attributes {stable_mosaic.version = 11 : i64} {
  func.func @ngram_kernel(%arg0: i32, %arg1: memref<256x2xi32, #tpu.memory_space<vmem>>, %arg2: memref<256x128xbf16, #tpu.memory_space<vmem>>, %arg3: memref<1x128xf32, #tpu.memory_space<vmem>>, %arg4: memref<128x128xbf16, #tpu.memory_space<vmem>>, %arg5: memref<1x128xf32, #tpu.memory_space<vmem>>, %arg6: memref<256x128xf32, #tpu.memory_space<vmem>>) attributes {dimension_semantics = [#tpu.dimension_semantics<parallel>], iteration_bounds = array<i64: 2>, scalar_prefetch = 0 : i64, scratch_operands = 0 : i64, tpu.core_type = #tpu.core_type<tc>, window_params = [{transform_indices = @transform_0, window_bounds = array<i64: 256, 2>}, {pipeline_mode = #tpu.pipeline_mode<synchronous>, transform_indices = @transform_1, window_bounds = array<i64: 256, 128>}, {pipeline_mode = #tpu.pipeline_mode<synchronous>, transform_indices = @transform_2, window_bounds = array<i64: 1, 128>}, {pipeline_mode = #tpu.pipeline_mode<synchronous>, transform_indices = @transform_3, window_bounds = array<i64: 128, 128>}, {pipeline_mode = #tpu.pipeline_mode<synchronous>, transform_indices = @transform_4, window_bounds = array<i64: 1, 128>}, {transform_indices = @transform_5, window_bounds = array<i64: 256, 128>}]} {
    %c0 = arith.constant 0 : index
    %c0_0 = arith.constant 0 : index
    %0 = vector.load %arg1[%c0, %c0_0] : memref<256x2xi32, #tpu.memory_space<vmem>>, vector<256x2xi32>
    %1 = tpu.iota {dimensions = array<i32: 1>} : vector<1x256xi32>
    %2 = vector.extract_strided_slice %0 {offsets = [0, 0], sizes = [256, 1], strides = [1, 1]} : vector<256x2xi32> to vector<256x1xi32>
    %3 = vector.broadcast %2 : vector<256x1xi32> to vector<256x256xi32>
    %4 = vector.broadcast %1 : vector<1x256xi32> to vector<256x256xi32>
    %5 = arith.cmpi eq, %3, %4 : vector<256x256xi32>
    %6 = vector.extract_strided_slice %0 {offsets = [0, 1], sizes = [256, 1], strides = [1, 1]} : vector<256x2xi32> to vector<256x1xi32>
    %7 = vector.broadcast %6 : vector<256x1xi32> to vector<256x256xi32>
    %8 = vector.broadcast %1 : vector<1x256xi32> to vector<256x256xi32>
    %9 = arith.cmpi eq, %7, %8 : vector<256x256xi32>
    %10 = arith.ori %5, %9 : vector<256x256xi1>
    %11 = arith.extui %10 : vector<256x256xi1> to vector<256x256xi32>
    %12 = arith.sitofp %11 : vector<256x256xi32> to vector<256x256xf32>
    %13 = arith.truncf %12 : vector<256x256xf32> to vector<256x256xbf16>
    %c0_1 = arith.constant 0 : index
    %c0_2 = arith.constant 0 : index
    %14 = vector.load %arg2[%c0_1, %c0_2] : memref<256x128xbf16, #tpu.memory_space<vmem>>, vector<256x128xbf16>
    %cst = arith.constant dense<0.000000e+00> : vector<256x128xf32>
    %15 = tpu.matmul %13, %14, %cst {dimension_numbers = #tpu.dot_dimension_numbers<[1], [0], [0], [1], [0, 0, 1, 1], [], []>} : vector<256x256xbf16>, vector<256x128xbf16>, vector<256x128xf32> -> vector<256x128xf32>
    %c0_3 = arith.constant 0 : index
    %c0_4 = arith.constant 0 : index
    %16 = vector.load %arg3[%c0_3, %c0_4] : memref<1x128xf32, #tpu.memory_space<vmem>>, vector<1x128xf32>
    %17 = vector.broadcast %16 : vector<1x128xf32> to vector<256x128xf32>
    %18 = arith.addf %15, %17 : vector<256x128xf32>
    %cst_5 = arith.constant 0.000000e+00 : f32
    %19 = vector.broadcast %cst_5 : f32 to vector<256x128xf32>
    %20 = arith.maximumf %18, %19 : vector<256x128xf32>
    %21 = arith.truncf %20 : vector<256x128xf32> to vector<256x128xbf16>
    %c0_6 = arith.constant 0 : index
    %c0_7 = arith.constant 0 : index
    %22 = vector.load %arg4[%c0_6, %c0_7] : memref<128x128xbf16, #tpu.memory_space<vmem>>, vector<128x128xbf16>
    %cst_8 = arith.constant dense<0.000000e+00> : vector<256x128xf32>
    %23 = tpu.matmul %21, %22, %cst_8 {dimension_numbers = #tpu.dot_dimension_numbers<[1], [0], [0], [1], [0, 0, 1, 1], [], []>} : vector<256x128xbf16>, vector<128x128xbf16>, vector<256x128xf32> -> vector<256x128xf32>
    %c0_9 = arith.constant 0 : index
    %c0_10 = arith.constant 0 : index
    %24 = vector.load %arg5[%c0_9, %c0_10] : memref<1x128xf32, #tpu.memory_space<vmem>>, vector<1x128xf32>
    %25 = vector.broadcast %24 : vector<1x128xf32> to vector<256x128xf32>
    %26 = arith.addf %23, %25 : vector<256x128xf32>
    %cst_11 = arith.constant dense<0xFF800000> : vector<256xf32>
    %27 = vector.multi_reduction <maximumf>, %26, %cst_11 [1] : vector<256x128xf32> to vector<256xf32>
    %28 = vector.shape_cast %27 : vector<256xf32> to vector<256x1xf32>
    %29 = vector.broadcast %28 : vector<256x1xf32> to vector<256x128xf32>
    %30 = arith.subf %26, %29 : vector<256x128xf32>
    %31 = math.exp %30 : vector<256x128xf32>
    %cst_12 = arith.constant dense<0.000000e+00> : vector<256xf32>
    %32 = vector.multi_reduction <add>, %31, %cst_12 [1] : vector<256x128xf32> to vector<256xf32>
    %33 = vector.shape_cast %32 : vector<256xf32> to vector<256x1xf32>
    %34 = math.log %33 : vector<256x1xf32>
    %35 = vector.broadcast %34 : vector<256x1xf32> to vector<256x128xf32>
    %36 = arith.subf %30, %35 : vector<256x128xf32>
    %c0_13 = arith.constant 0 : index
    %c0_14 = arith.constant 0 : index
    %37 = vector.load %arg6[%c0_13, %c0_14] : memref<256x128xf32, #tpu.memory_space<vmem>>, vector<256x128xf32>
    tpu.vector_store %arg6[%c0_13, %c0_14], %36 {strides = array<i32>} : memref<256x128xf32, #tpu.memory_space<vmem>>, vector<256x128xf32>,
    return
  }
  func.func @transform_0(%arg0: i32) -> (i32, i32) {
    %c0_i32 = arith.constant 0 : i32
    %c0_i32_0 = arith.constant 0 : i32
    return %arg0, %c0_i32 : i32, i32
  }
  func.func @transform_1(%arg0: i32) -> (i32, i32) {
    %c0_i32 = arith.constant 0 : i32
    %c0_i32_0 = arith.constant 0 : i32
    %c0_i32_1 = arith.constant 0 : i32
    return %c0_i32, %c0_i32_0 : i32, i32
  }
  func.func @transform_2(%arg0: i32) -> (i32, i32) {
    %c0_i32 = arith.constant 0 : i32
    %c0_i32_0 = arith.constant 0 : i32
    %c0_i32_1 = arith.constant 0 : i32
    return %c0_i32, %c0_i32_0 : i32, i32
  }
  func.func @transform_3(%arg0: i32) -> (i32, i32) {
    %c0_i32 = arith.constant 0 : i32
    %c0_i32_0 = arith.constant 0 : i32
    %c0_i32_1 = arith.constant 0 : i32
    return %c0_i32, %c0_i32_0 : i32, i32
  }
  func.func @transform_4(%arg0: i32) -> (i32, i32) {
    %c0_i32 = arith.constant 0 : i32
    %c0_i32_0 = arith.constant 0 : i32
    %c0_i32_1 = arith.constant 0 : i32
    return %c0_i32, %c0_i32_0 : i32, i32
  }
  func.func @transform_5(%arg0: i32) -> (i32, i32) {
    %c0_i32 = arith.constant 0 : i32
    %c0_i32_0 = arith.constant 0 : i32
    return %arg0, %c0_i32 : i32, i32
  }
}

</mosaic_0001>

<bundles_post_ra>
// kernel: tpu_custom_call.1
= control target key start
LH: loop header
LB: loop body
LE: loop exit
PB: predicated region body
PF: predicated region fallthrough
CT: control target
= control target key end

     0   :  { %10 = vsyncpa [#allocation3], 0  ;;  %s3298_s0 = inlined_call_operand.vmem [shape: s32[512,2], index: 0, kind: input, shape index: {}]   ;;  %s3299_s1 = inlined_call_operand.vmem [shape: bf16[256,128], index: 1, kind: input, shape index: {}]   ;;  %s3300_s2 = inlined_call_operand.vmem [shape: f32[1,128], index: 2, kind: input, shape index: {}]   ;;  %s3301_s3 = inlined_call_operand.vmem [shape: bf16[128,128], index: 3, kind: input, shape index: {}]   ;;  %s3302_s4 = inlined_call_operand.vmem [shape: f32[1,128], index: 4, kind: input, shape index: {}]   ;;  %s3303_s5 = inlined_call_operand.hbm [shape: f32[512,128], index: 5, kind: output, shape index: {}]  }
   0x1   :  { %12 = vsyncpa [#allocation3 + $0x1], 0  ;;  %s2346_s18 = smov 0   ;;  %s2348_s19 = smov 0  }
   0x2   :  { %s2350_s20 = smov 0   ;;  %s2352_s21 = smov 0  }
   0x3 LB: > { %s2367_s22 = sadd.s32 4294967295, %s2309_s21   ;;  %s1750_s23 = sadd.s32 4294967294, %s2309_s21   ;;  %s2309_s21 = sphi %s2352_s21, %s3355_s21   ;;  %s2305_s20 = sphi %s2350_s20, %s3354_s20   ;;  %s2301_s19 = sphi %s2348_s19, %s3353_s19   ;;  %s2297_s18 = sphi %s2346_s18, %s3352_s18  }
   0x4   : > { %s2371_s24 = sadd.s32 1, %s2309_s21   ;;  %s135_s25 = sadd.s32 1, %s2305_s20 }
   0x5   : > { %s132_s26 = ssub.s32 %s2309_s21, %s2371_s24  ;;  %p145_p0 = scmp.ne.s32.totalorder %s2305_s20, %s2301_s19 }
   0x6   : > { %p133_p1 = scmp.eq.s32.totalorder %s132_s26, 0  ;;  %p146_p2 = scmp.eq.s32.totalorder %s2367_s22, 1 }
   0x7   : > { %p151_p3 = scmp.ne.s32.totalorder %s2301_s19, %s2297_s18  ;;  %p152_p4 = scmp.eq.s32.totalorder %s1750_s23, 1 }
   0x8   : > { %s2382_s27 = scalar_select %p133_p1, %s2305_s20, %s135_s25  }
   0x9   : > { %p2384_p5 = por %p146_p2, %p145_p0  ;;  %p2388_p6 = por %p152_p4, %p151_p3 }
   0xa   : > { %p1753_p7 = scmp.ge.s32.totalorder %s2309_s21, 1  ;;  %p191_p8 = scmp.lt.s32.totalorder %s2309_s21, 3 }
   0xc   : > { %p192_p9 = pnand %p1753_p7, %p191_p8 }
   0xd   : > { %s1755_s30 = sshll.u32 (!%p192_p9), %s2367_s22, 5  ;;  %s216_s15 = sand.u32 (!%p192_p9), 1, %s2301_s19  }
   0xe   : > { %195 = sbr.rel (%p192_p9) target bundleno = 929 (0x3a1), region = 40  ;;  %p220_p10 = scmp.lt.s32.totalorder (!%p192_p9), %s1755_s30, 63 }
   0xf   : > { %s1754_s16 = sshll.u32 (!%p192_p9), %s216_s15, 8  ;;  %s2010_s23 = sshll.u32 (!%p192_p9), %s2367_s22, 8 }
  0x10   : > { %s3160_s17 = scalar_lea.vmem (!%p192_p9), [#allocation2], %s1754_s16  ;;  %s1673_s7 = scalar_lea.sflag (!%p192_p9), [#allocation3], %s216_s15 }
  0x11   : > { %s1685_s22 = sshll.u32 (!%p192_p9), %s3160_s17, 4  ;;  %s2267_s12 = scalar_lea.hbm (!%p192_p9), %s3303_s5, 512  ;;  %s1686_s22 = int_to_ptr.vmem [resolvable:$true] %s1685_s22 }
  0x13   : > { %v2311_v0 = vmov 1   ;;  %v2312_v1 = vmov 0   ;;  %s3357_s30 = smov (!%p220_p10, %s1755_s30), 63  ;;  %v1993_v15 = vld [vmem:[%s3299_s1 + $0x38] sm:$0xff]  ;;  %v1992_v18 = vld [vmem:[%s3299_s1 + $0x30] sm:$0xff]  ;;  %v1991_v21 = vld [vmem:[%s3299_s1 + $0x28] sm:$0xff]  ;;  %v258_v42 = vlaneseq }
  0x14   : > { %2080 = vset.pattern.permute.xlu1 %v2311_v0  ;;  %2081 = vset.pattern.permute.xlu2 %v2312_v1  ;;  %s1756_s6 = sshll.u32 %s3357_s30, 3  ;;  %v2432_v16 = vld [vmem:[%s3299_s1 + $0x78] sm:$0xff]  ;;  %v2000_v20 = vld [vmem:[%s3299_s1 + $0x70] sm:$0xff]  ;;  %v1999_v22 = vld [vmem:[%s3299_s1 + $0x68] sm:$0xff]  ;;  %v2313_v53 = vmov 1.0|1.0   ;;  %s1684_s30 = scalar_lea.hbm %s3303_s5, %s2010_s23 }
  0x15   : > { %2079 = vset.pattern.permute.xlu0 %v2312_v1  ;;  %s2401_s9 = scalar_lea.vmem %s3298_s0, %s1756_s6  ;;  %937 = vmatpush.bf16.msra.mxu0 %v1993_v15  ;;  %v1990_v24 = vld [vmem:[%s3299_s1 + $0x20] sm:$0xff]  ;;  %v1989_v26 = vld [vmem:[%s3299_s1 + $0x18] sm:$0xff]  ;;  %v1988_v30 = vld [vmem:[%s3299_s1 + $0x10] sm:$0xff]  ;;  %v2507_v44 = vand.u32 127, %v258_v42  ;;  %s1687_s6 = sshll.u32 %s1684_s30, 4  ;;  %s1688_s6 = int_to_ptr.hbm [resolvable:$true] %s1687_s6 }
  0x16   : > { %v228_v2 = vld [vmem:[%s2401_s9 + $0x10] sm:$0xff]  ;;  %v226_v3 = vld [vmem:[%s2401_s9] sm:$0xff]  ;;  %v229_v4 = vld [vmem:[%s2401_s9 + $0x18] sm:$0xff]  ;;  %1026 = vmatpush.bf16.msra.mxu1 %v2432_v16  ;;  %2011 = vmatpush.bf16.msra.mxu3 %v1993_v15  ;;  %s2261_s8 = sshra.s32 %s1688_s6, 4  ;;  %s2262_s8 = int_to_ptr.hbm [resolvable:$true] %s2261_s8 }
  0x17   : > { %268 = vperm.xlu2 %2081, %v228_v2   ;;  %422 = vperm.xlu1 %2080, %v226_v3   ;;  %v227_v5 = vld [vmem:[%s2401_s9 + $0x8] sm:$0xff]  ;;  %v230_v6 = vld [vmem:[%s2401_s9 + $0x20] sm:$0xff]  ;;  %v232_v9 = vld [vmem:[%s2401_s9 + $0x30] sm:$0xff]  ;;  %v2512_v48 = vadd.s32 128, %v2507_v44  ;;  %s2263_s10 = scalar_lea.hbm %s2262_s8, 256  ;;  %p2268_p0 = scmp.lt.s32.totalorder %s2262_s8, %s3303_s5 }
  0x18   : > { %262 = vperm.xlu0 %2079, %v226_v3   ;;  %v231_v7 = vld [vmem:[%s2401_s9 + $0x28] sm:$0xff]  ;;  %v233_v10 = vld [vmem:[%s2401_s9 + $0x38] sm:$0xff]  ;;  %v250_v11 = vld [vmem:[%s2401_s9 + $0xc0] sm:$0xff]  ;;  %p2264_p11 = scmp.ne.s32.totalorder %s2262_s8, %s2263_s10  ;;  %p2269_p1 = scmp.lt.s32.totalorder %s2267_s12, %s2263_s10 }
  0x19   : > { %v251_v8 = vld [vmem:[%s2401_s9 + $0xc8] sm:$0xff]  ;;  %v234_v12 = vld [vmem:[%s2401_s9 + $0x40] sm:$0xff]  ;;  %v253_v13 = vld [vmem:[%s2401_s9 + $0xd8] sm:$0xff]  ;;  %938 = vmatpush.bf16.msra.mxu0 %v1992_v18 }
  0x1a   : > { %v235_v14 = vld [vmem:[%s2401_s9 + $0x48] sm:$0xff]  ;;  %v236_v17 = vld [vmem:[%s2401_s9 + $0x50] sm:$0xff]  ;;  %1027 = vmatpush.bf16.msra.mxu1 %v2000_v20  ;;  %2012 = vmatpush.bf16.msra.mxu3 %v1992_v18  ;;  %v1998_v25 = vld [vmem:[%s3299_s1 + $0x60] sm:$0xff]  ;;  %p2265_p12 = pnand %p2264_p11, %p2384_p5  ;;  %p2270_p2 = por %p2269_p1, %p2268_p0 }
  0x1b   : > { %v252_v19 = vld [vmem:[%s2401_s9 + $0xd0] sm:$0xff]  ;;  %v255_v23 = vld [vmem:[%s2401_s9 + $0xe8] sm:$0xff]  ;;  %v1997_v27 = vld [vmem:[%s3299_s1 + $0x58] sm:$0xff] }
  0x1c   : > { %v237_v28 = vld [vmem:[%s2401_s9 + $0x58] sm:$0xff]  ;;  %v238_v29 = vld [vmem:[%s2401_s9 + $0x60] sm:$0xff]  ;;  %v1996_v31 = vld [vmem:[%s3299_s1 + $0x50] sm:$0xff]  ;;  %p2266_p13 = pneg %p2265_p12 }
  0x1d   : > { %939 = vmatpush.bf16.msra.mxu0 %v1991_v21  ;;  %v1987_v32 = vld [vmem:[%s3299_s1 + $0x8] sm:$0xff]  ;;  %v254_v35 = vld [vmem:[%s2401_s9 + $0xe0] sm:$0xff]  ;;  %v2486_v36 = vld [vmem:[%s2401_s9 + $0xf8] sm:$0xff] }
  0x1e   : > { %1028 = vmatpush.bf16.msra.mxu1 %v1999_v22  ;;  %2013 = vmatpush.bf16.msra.mxu3 %v1991_v21  ;;  %v1995_v33 = vld [vmem:[%s3299_s1 + $0x48] sm:$0xff]  ;;  %v1986_v37 = vld [vmem:[%s3299_s1] sm:$0xff]  ;;  %v240_v40 = vld [vmem:[%s2401_s9 + $0x70] sm:$0xff]  ;;  %p2271_p3 = pnand %p2270_p2, %p2266_p13 }
  0x1f   : > { %271 = vperm.xlu2 %2081, %v229_v4   ;;  %425 = vperm.xlu1 %2080, %v227_v5   ;;  %v1994_v38 = vld [vmem:[%s3299_s1 + $0x40] sm:$0xff]  ;;  %v239_v43 = vld [vmem:[%s2401_s9 + $0x68] sm:$0xff]  ;;  %v256_v49 = vld [vmem:[%s2401_s9 + $0xf0] sm:$0xff] }
  0x20   : > { %265 = vperm.xlu0 %2079, %v227_v5   ;;  %v243_v54 = vld [vmem:[%s2401_s9 + $0x88] sm:$0xff]  ;;  %v244_v59 = vld [vmem:[%s2401_s9 + $0x90] sm:$0xff]  ;;  %v241_v61 = vld [vmem:[%s2401_s9 + $0x78] sm:$0xff] }
  0x21   : > { %940 = vmatpush.bf16.msra.mxu0 %v1990_v24  ;;  %v245_v15 = vld [vmem:[%s2401_s9 + $0x98] sm:$0xff] }
  0x22   : > { %1029 = vmatpush.bf16.msra.mxu1 %v1998_v25  ;;  %2014 = vmatpush.bf16.msra.mxu3 %v1990_v24 }
  0x25   : > { %941 = vmatpush.bf16.msra.mxu0 %v1989_v26 }
  0x26   : > { %1030 = vmatpush.bf16.msra.mxu1 %v1997_v27  ;;  %2015 = vmatpush.bf16.msra.mxu3 %v1989_v26 }
  0x27   : > { %274 = vperm.xlu2 %2081, %v230_v6   ;;  %431 = vperm.xlu1 %2080, %v229_v4   ;;  %v242_v4 = vld [vmem:[%s2401_s9 + $0x80] sm:$0xff] }
  0x28   : > { %2082 = vset.pattern.permute.xlu0 %v2311_v0 }
  0x29   : > { %428 = vperm.xlu0 %2082, %v228_v2   ;;  %942 = vmatpush.bf16.msra.mxu0 %v1988_v30  ;;  %v3315_v2 = vmov 0 }
  0x2a   : > { %1031 = vmatpush.bf16.msra.mxu1 %v1996_v31  ;;  %2016 = vmatpush.bf16.msra.mxu3 %v1988_v30 }
  0x2d   : > { %943 = vmatpush.bf16.msra.mxu0 %v1987_v32 }
  0x2e   : > { %1032 = vmatpush.bf16.msra.mxu1 %v1995_v33  ;;  %2017 = vmatpush.bf16.msra.mxu3 %v1987_v32 }
  0x2f   : > { %2084 = vset.pattern.permute.xlu2 %v2311_v0  ;;  %2083 = vset.pattern.permute.xlu1 %v2312_v1 }
  0x30   : > { %434 = vperm.xlu2 %2084, %v230_v6   ;;  %277 = vperm.xlu1 %2083, %v231_v7  }
  0x31   : > { %2087 = vset.pattern.permute.xlu0 %v2312_v1  ;;  %944 = vmatpush.bf16.msra.mxu0 %v1986_v37 }
  0x32   : > { %337 = vperm.xlu0 %2087, %v251_v8   ;;  %1033 = vmatpush.bf16.msra.mxu1 %v1994_v38 }
  0x33   : > { %2018 = vmatpush.bf16.msra.mxu3 %v1986_v37 }
  0x37   : > { %2019 = vmatpush.bf16.msrb.mxu3 %v2432_v16  ;;  %v3321_v16 = vmov 0 }
  0x38   : > { %280 = vperm.xlu1 %2083, %v232_v9   ;;  %2085 = vset.pattern.permute.xlu2 %v2312_v1 }
  0x39   : > { %283 = vperm.xlu2 %2085, %v233_v10  }
  0x3a   : > { %2088 = vset.pattern.permute.xlu0 %v2311_v0 }
  0x3b   : > { %437 = vperm.xlu0 %2088, %v231_v7   ;;  %2020 = vmatpush.bf16.msrb.mxu3 %v2000_v20  ;;  %v2571_v7 = vld [vmem:[%s2401_s9 + $0xa8] sm:$0xff] }
  0x3f   : > { %2021 = vmatpush.bf16.msrb.mxu3 %v1999_v22 }
  0x40   : > { %2086 = vset.pattern.permute.xlu1 %v2311_v0 }
  0x41   : > { %443 = vperm.xlu1 %2086, %v233_v10   ;;  %334 = vperm.xlu2 %2085, %v250_v11  }
  0x43   : > { %440 = vperm.xlu0 %2088, %v232_v9   ;;  %2022 = vmatpush.bf16.msrb.mxu3 %v1998_v25 }
  0x47   : > { %2023 = vmatpush.bf16.msrb.mxu3 %v1997_v27  ;;  %v3325_v27 = vmov 0 }
  0x49   : > { %494 = vperm.xlu1 %2086, %v250_v11   ;;  %2089 = vset.pattern.permute.xlu2 %v2311_v0  ;;  %v2596_v11 = vld [vmem:[%s2401_s9 + $0xb0] sm:$0xff] }
  0x4a   : > { %497 = vperm.xlu2 %2089, %v251_v8  }
  0x4b   : > { %446 = vperm.xlu0 %2088, %v234_v12   ;;  %2024 = vmatpush.bf16.msrb.mxu3 %v1996_v31  ;;  %v249_v31 = vld [vmem:[%s2401_s9 + $0xb8] sm:$0xff] }
  0x4f   : > { %2025 = vmatpush.bf16.msrb.mxu3 %v1995_v33  ;;  %v3331_v33 = vmov 0 }
  0x51   : > { %2090 = vset.pattern.permute.xlu1 %v2312_v1 }
  0x52   : > { %286 = vperm.xlu1 %2090, %v234_v12   ;;  %2091 = vset.pattern.permute.xlu2 %v2312_v1 }
  0x53   : > { %503 = vperm.xlu0 %2088, %v253_v13   ;;  %289 = vperm.xlu2 %2091, %v235_v14  }
  0x54   : > { %2026 = vmatpush.bf16.msrb.mxu3 %v1994_v38  ;;  %v2007_v38 = vld [vmem:[%s3301_s3 + $0x28] sm:$0xff] }
  0x5a   : > { %2092 = vset.pattern.permute.xlu1 %v2311_v0 }
  0x5b   : > { %449 = vperm.xlu1 %2092, %v235_v14   ;;  %452 = vperm.xlu0 %2088, %v236_v17  }
  0x5c   : > { %340 = vperm.xlu2 %2091, %v252_v19  }
  0x63   : > { %2093 = vset.pattern.permute.xlu1 %v2312_v1  ;;  %2097 = vset.pattern.permute.xlu0 %v2312_v1 }
  0x64   : > { %343 = vperm.xlu1 %2093, %v253_v13   ;;  %2094 = vset.pattern.permute.xlu2 %v2311_v0 }
  0x65   : > { %500 = vperm.xlu2 %2094, %v252_v19   ;;  %349 = vperm.xlu0 %2097, %v255_v23   ;;  %v3323_v19 = vmov 0 }
  0x6c   : > { %292 = vperm.xlu1 %2093, %v236_v17  }
  0x6d   : > { %2095 = vset.pattern.permute.xlu2 %v2312_v1  ;;  %2101 = vset.pattern.permute.xlu0 %v2311_v0 }
  0x6e   : > { %295 = vperm.xlu2 %2095, %v237_v28   ;;  %458 = vperm.xlu0 %2101, %v238_v29  }
  0x71   : > { %v2482_v34 = vpop.permute.xlu2 %268 }
  0x74   : > { %2096 = vset.pattern.permute.xlu1 %v2311_v0 }
  0x75   : > { %455 = vperm.xlu1 %2096, %v237_v28  }
  0x76   : > { %346 = vperm.xlu2 %2095, %v254_v35   ;;  %515 = vperm.xlu0 %2101, %v2486_v36  }
  0x79   : > { %v2496_v39 = vpop.permute.xlu2 %271 }
  0x7d   : > { %506 = vperm.xlu1 %2096, %v254_v35  }
  0x7e   : > { %2098 = vset.pattern.permute.xlu2 %v2311_v0  ;;  %464 = vperm.xlu0 %2101, %v240_v40  }
  0x7f   : > { %509 = vperm.xlu2 %2098, %v255_v23   ;;  %v246_v23 = vld [vmem:[%s2401_s9 + $0xa0] sm:$0xff] }
  0x81   : > { %v2501_v41 = vpop.permute.xlu2 %274 }
  0x85   : > { %2099 = vset.pattern.permute.xlu1 %v2312_v1 }
  0x86   : > { %298 = vperm.xlu1 %2099, %v238_v29   ;;  %2107 = vset.pattern.permute.xlu0 %v2312_v1 }
  0x87   : > { %2100 = vset.pattern.permute.xlu2 %v2312_v1  ;;  %313 = vperm.xlu0 %2107, %v243_v54  }
  0x88   : > { %301 = vperm.xlu2 %2100, %v239_v43  }
  0x89   : > { %v423_v45 = vpop.permute.xlu1 %422 }
  0x8a   : > { %v263_v46 = vpop.permute.xlu0 %262  ;;  %v2509_v47 = vpop.permute.xlu2 %434  ;;  %vm517_vm0 = vcmp.eq.s32.totalorder %v423_v45, %v2507_v44  ;;  %vm518_vm2 = vcmp.eq.s32.totalorder %v423_v45, %v2512_v48  ;;  %v3335_v45 = vmov 0 }
  0x8b   : > { %vm357_vm1 = vcmp.eq.s32.totalorder %v263_v46, %v2507_v44  ;;  %vm358_vm3 = vcmp.eq.s32.totalorder %v263_v46, %v2512_v48 }
  0x8c   : > { %vm581_vm5 = vmor %vm357_vm1, %vm517_vm0  ;;  %vm363_vm0 = vcmp.eq.s32.totalorder %v2496_v39, %v2507_v44 }
  0x8d   : > { %vm582_vm9 = vmor %vm358_vm3, %vm518_vm2  ;;  %vm361_vm2 = vcmp.eq.s32.totalorder %v2482_v34, %v2507_v44 }
  0x8e   : > { %2102 = vset.pattern.permute.xlu1 %v2311_v0 }
  0x8f   : > { %461 = vperm.xlu1 %2102, %v239_v43   ;;  %2111 = vset.pattern.permute.xlu0 %v2311_v0  ;;  %v2005_v43 = vld [vmem:[%s3301_s3 + $0x18] sm:$0xff] }
  0x90   : > { %352 = vperm.xlu2 %2100, %v256_v49   ;;  %476 = vperm.xlu0 %2111, %v244_v59  }
  0x91   : > { %v426_v50 = vpop.permute.xlu1 %425 }
  0x92   : > { %vm519_vm4 = vcmp.eq.s32.totalorder %v426_v50, %v2507_v44  ;;  %v266_v51 = vpop.permute.xlu0 %265  ;;  %vm520_vm6 = vcmp.eq.s32.totalorder %v426_v50, %v2512_v48  ;;  %v2003_v50 = vld [vmem:[%s3301_s3 + $0x8] sm:$0xff] }
  0x93   : > { %vm359_vm7 = vcmp.eq.s32.totalorder %v266_v51, %v2507_v44  ;;  %vm360_vm8 = vcmp.eq.s32.totalorder %v266_v51, %v2512_v48  ;;  %v2524_v52 = vpop.permute.xlu2 %283 }
  0x94   : > { %vm583_vm10 = vmor %vm359_vm7, %vm519_vm4  ;;  %vm362_vm7 = vcmp.eq.s32.totalorder %v2482_v34, %v2512_v48 }
  0x95   : > { %vm1885_vm11 = vmpackc.low %vm583_vm10, %vm581_vm5  ;;  %vm364_vm5 = vcmp.eq.s32.totalorder %v2496_v39, %v2512_v48  ;;  %v2006_v39 = vld [vmem:[%s3301_s3 + $0x20] sm:$0xff] }
  0x96   : > { %1886 = vmatmul.msk.bf16.vlgmr.msra.gmra.mxu0 %vm1885_vm11, %v2313_v53  ;;  %vm584_vm12 = vmor %vm360_vm8, %vm520_vm6 }
  0x97   : > { %vm1917_vm13 = vmpackc.low %vm584_vm12, %vm582_vm9  ;;  %2103 = vset.pattern.permute.xlu1 %v2312_v1 }
  0x98   : > { %1918 = vmatmul.msk.bf16.vlgmr.msra.gmra.mxu1 %vm1917_vm13, %v2313_v53  ;;  %355 = vperm.xlu1 %2103, %v2486_v36   ;;  %v2008_v36 = vld [vmem:[%s3301_s3 + $0x30] sm:$0xff] }
  0x99   : > { %v432_v55 = vpop.permute.xlu1 %431  ;;  %2104 = vset.pattern.permute.xlu2 %v2311_v0  ;;  %485 = vperm.xlu0 %2111, %v2571_v7  }
  0x9a   : > { %512 = vperm.xlu2 %2104, %v256_v49   ;;  %vm523_vm14 = vcmp.eq.s32.totalorder %v432_v55, %v2507_v44  ;;  %vm524_vm1 = vcmp.eq.s32.totalorder %v432_v55, %v2512_v48 }
  0x9b   : > { %v2532_v56 = vpop.permute.xlu2 %334  ;;  %v429_v57 = vpop.permute.xlu0 %428  ;;  %vm2542_vm4 = vmor %vm363_vm0, %vm523_vm14  ;;  %vm365_vm0 = vcmp.eq.s32.totalorder %v2501_v41, %v2507_v44 }
  0x9c   : > { %vm521_vm15 = vcmp.eq.s32.totalorder %v429_v57, %v2507_v44  ;;  %vm522_vm3 = vcmp.eq.s32.totalorder %v429_v57, %v2512_v48  ;;  %vm588_vm8 = vmor %vm364_vm5, %vm524_vm1  ;;  %vm525_vm1 = vcmp.eq.s32.totalorder %v2509_v47, %v2507_v44  ;;  %vm366_vm5 = vcmp.eq.s32.totalorder %v2501_v41, %v2512_v48 }
  0x9d   : > { %vm585_vm6 = vmor %vm361_vm2, %vm521_vm15  ;;  %v3333_v41 = vmov 0  ;;  %v3337_v57 = vmov 0 }
  0x9e   : > { %vm586_vm9 = vmor %vm362_vm7, %vm522_vm3 }
  0x9f   : > { %vm1887_vm11 = vmpackc.low %vm2542_vm4, %vm585_vm6  ;;  %vm526_vm6 = vcmp.eq.s32.totalorder %v2509_v47, %v2512_v48  ;;  %v2004_v47 = vld [vmem:[%s3301_s3 + $0x10] sm:$0xff] }
  0xa0   : > { %304 = vperm.xlu1 %2103, %v240_v40   ;;  %vm1919_vm14 = vmpackc.low %vm588_vm8, %vm586_vm9 }
  0xa1   : > { %vm589_vm8 = vmor %vm365_vm0, %vm525_vm1  ;;  %vm371_vm1 = vcmp.eq.s32.totalorder %v2524_v52, %v2507_v44  ;;  %488 = vperm.xlu0 %2111, %v2596_v11  }
  0xa2   : > { %v278_v60 = vpop.permute.xlu1 %277  ;;  %2105 = vset.pattern.permute.xlu2 %v2312_v1 }
  0xa3   : > { %307 = vperm.xlu2 %2105, %v241_v61   ;;  %vm367_vm2 = vcmp.eq.s32.totalorder %v278_v60, %v2507_v44  ;;  %vm368_vm7 = vcmp.eq.s32.totalorder %v278_v60, %v2512_v48  ;;  %v2796_v60 = vld [vmem:[%s3300_s2] ss:$0 sm:$0xff] }
  0xa4   : > { %v338_v62 = vpop.permute.xlu0 %337  ;;  %v498_v63 = vpop.permute.xlu2 %497 }
  0xa5   : > { %vm408_vm10 = vcmp.eq.s32.totalorder %v338_v62, %v2512_v48  ;;  %vm568_vm12 = vcmp.eq.s32.totalorder %v498_v63, %v2512_v48 }
  0xa6   : > { %1888 = vmatmul.msk.bf16.gmra.mxu0 %vm1887_vm11, %v2313_v53  ;;  %vm2559_vm13 = vmor %vm408_vm10, %vm568_vm12 }
  0xa7   : > { %v3316_v2 = vsel %vm2559_vm13, 4294967295, %v3315_v2  ;;  %vm590_vm11 = vmor %vm366_vm5, %vm526_vm6 }
  0xa8   : > { %1920 = vmatmul.msk.bf16.gmra.mxu1 %vm1919_vm14, %v2313_v53  ;;  %2106 = vset.pattern.permute.xlu1 %v2311_v0  ;;  %vm407_vm14 = vcmp.eq.s32.totalorder %v338_v62, %v2507_v44 }
  0xa9   : > { %467 = vperm.xlu1 %2106, %v241_v61  }
  0xaa   : > { %v2565_v3 = vpop.permute.xlu1 %280 }
  0xab   : > { %310 = vperm.xlu2 %2105, %v242_v4  }
  0xad   : > { %v438_v5 = vpop.permute.xlu0 %437  ;;  %v2568_v6 = vpop.permute.xlu2 %289 }
  0xae   : > { %vm527_vm15 = vcmp.eq.s32.totalorder %v438_v5, %v2507_v44  ;;  %vm528_vm3 = vcmp.eq.s32.totalorder %v438_v5, %v2512_v48 }
  0xaf   : > { %vm591_vm4 = vmor %vm367_vm2, %vm527_vm15  ;;  %vm567_vm15 = vcmp.eq.s32.totalorder %v498_v63, %v2507_v44 }
  0xb0   : > { %vm592_vm9 = vmor %vm368_vm7, %vm528_vm3  ;;  %vm406_vm3 = vcmp.eq.s32.totalorder %v2532_v56, %v2512_v48  ;;  %vm405_vm7 = vcmp.eq.s32.totalorder %v2532_v56, %v2507_v44 }
  0xb1   : > { %470 = vperm.xlu1 %2106, %v242_v4   ;;  %vm1889_vm10 = vmpackc.low %vm591_vm4, %vm589_vm8 }
  0xb2   : > { %vm1921_vm12 = vmpackc.low %vm592_vm9, %vm590_vm11 }
  0xb3   : > { %v444_v8 = vpop.permute.xlu1 %443  ;;  %2108 = vset.pattern.permute.xlu2 %v2311_v0  ;;  %vm2600_vm2 = vmor %vm407_vm14, %vm567_vm15  ;;  %vm369_vm14 = vcmp.eq.s32.totalorder %v2565_v3, %v2507_v44 }
  0xb4   : > { %473 = vperm.xlu2 %2108, %v243_v54   ;;  %vm531_vm0 = vcmp.eq.s32.totalorder %v444_v8, %v2507_v44  ;;  %vm532_vm15 = vcmp.eq.s32.totalorder %v444_v8, %v2512_v48 }
  0xb5   : > { %v441_v9 = vpop.permute.xlu0 %440  ;;  %vm2609_vm6 = vmor %vm371_vm1, %vm531_vm0 }
  0xb6   : > { %1890 = vmatmul.msk.bf16.gmra.mxu0 %vm1889_vm10, %v2313_v53  ;;  %v2588_v10 = vpop.permute.xlu2 %340  ;;  %vm529_vm9 = vcmp.eq.s32.totalorder %v441_v9, %v2507_v44 }
  0xb7   : > { %vm410_vm11 = vcmp.eq.s32.totalorder %v2588_v10, %v2512_v48 }
  0xb8   : > { %1922 = vmatmul.msk.bf16.gmra.mxu1 %vm1921_vm12, %v2313_v53 }
  0xb9   : > { %2109 = vset.pattern.permute.xlu1 %v2312_v1 }
  0xba   : > { %316 = vperm.xlu1 %2109, %v244_v59  }
  0xbb   : > { %v495_v12 = vpop.permute.xlu1 %494 }
  0xbc   : > { %vm565_vm4 = vcmp.eq.s32.totalorder %v495_v12, %v2507_v44  ;;  %vm566_vm5 = vcmp.eq.s32.totalorder %v495_v12, %v2512_v48  ;;  %2110 = vset.pattern.permute.xlu2 %v2312_v1 }
  0xbd   : > { %vm2617_vm8 = vmor %vm406_vm3, %vm566_vm5  ;;  %v447_v17 = vpop.permute.xlu0 %446  ;;  %319 = vperm.xlu2 %2110, %v245_v15   ;;  %vm530_vm3 = vcmp.eq.s32.totalorder %v441_v9, %v2512_v48 }
  0xbe   : > { %v3322_v16 = vsel %vm2617_vm8, 4294967295, %v3321_v16  ;;  %vm629_vm10 = vmor %vm405_vm7, %vm565_vm4  ;;  %vm370_vm7 = vcmp.eq.s32.totalorder %v2565_v3, %v2512_v48 }
  0xbf   : > { %vm1909_vm12 = vmpackc.low %vm2600_vm2, %vm629_vm10  ;;  %v501_v18 = vpop.permute.xlu2 %500  ;;  %vm372_vm2 = vcmp.eq.s32.totalorder %v2524_v52, %v2512_v48  ;;  %v2002_v52 = vld [vmem:[%s3301_s3] sm:$0xff] }
  0xc0   : > { %1910 = vmatmul.msk.bf16.vlgmr.msra.gmra.mxu3 %vm1909_vm12, %v2313_v53  ;;  %vm570_vm0 = vcmp.eq.s32.totalorder %v501_v18, %v2512_v48  ;;  %vm593_vm4 = vmor %vm369_vm14, %vm529_vm9 }
  0xc1   : > { %vm2639_vm5 = vmor %vm410_vm11, %vm570_vm0  ;;  %vm409_vm11 = vcmp.eq.s32.totalorder %v2588_v10, %v2507_v44 }
  0xc2   : > { %2112 = vset.pattern.permute.xlu1 %v2311_v0  ;;  %v3324_v19 = vsel %vm2639_vm5, 4294967295, %v3323_v19  ;;  %vm596_vm10 = vmor %vm372_vm2, %vm532_vm15  ;;  %vm533_vm15 = vcmp.eq.s32.totalorder %v447_v17, %v2507_v44 }
  0xc3   : > { %479 = vperm.xlu1 %2112, %v245_v15   ;;  %vm594_vm12 = vmor %vm370_vm7, %vm530_vm3  ;;  %vm376_vm7 = vcmp.eq.s32.totalorder %v2568_v6, %v2512_v48 }
  0xc4   : > { %v287_v20 = vpop.permute.xlu1 %286  ;;  %vm1891_vm1 = vmpackc.low %vm2609_vm6, %vm593_vm4  ;;  %vm569_vm6 = vcmp.eq.s32.totalorder %v501_v18, %v2507_v44 }
  0xc5   : > { %vm1923_vm9 = vmpackc.low %vm596_vm10, %vm594_vm12  ;;  %v504_v21 = vpop.permute.xlu0 %503  ;;  %322 = vperm.xlu2 %2110, %v246_v23   ;;  %vm373_vm0 = vcmp.eq.s32.totalorder %v287_v20, %v2507_v44  ;;  %vm534_vm10 = vcmp.eq.s32.totalorder %v447_v17, %v2512_v48  ;;  %vm374_vm12 = vcmp.eq.s32.totalorder %v287_v20, %v2512_v48 }
  0xc6   : > { %1892 = vmatmul.msk.bf16.gmra.mxu0 %vm1891_vm1, %v2313_v53  ;;  %vm375_vm1 = vcmp.eq.s32.totalorder %v2568_v6, %v2507_v44  ;;  %vm2665_vm4 = vmor %vm409_vm11, %vm569_vm6  ;;  %vm571_vm6 = vcmp.eq.s32.totalorder %v504_v21, %v2507_v44 }
  0xc7   : > { %v3326_v27 = vsel %vm2665_vm4, 4294967295, %v3325_v27  ;;  %vm598_vm11 = vmor %vm374_vm12, %vm534_vm10 }
  0xc8   : > { %1924 = vmatmul.msk.bf16.gmra.mxu1 %vm1923_vm9, %v2313_v53  ;;  %v2649_v22 = vpop.permute.xlu2 %295  ;;  %vm597_vm9 = vmor %vm373_vm0, %vm533_vm15  ;;  %vm572_vm15 = vcmp.eq.s32.totalorder %v504_v21, %v2512_v48  ;;  %vm3327_vm0 = vnez %v3326_v27 }
  0xcb   : > { %2113 = vset.pattern.permute.xlu1 %v2312_v1 }
  0xcc   : > { %325 = vperm.xlu1 %2113, %v2571_v7  }
  0xcd   : > { %v450_v24 = vpop.permute.xlu1 %449  ;;  %v453_v26 = vpop.permute.xlu0 %452  ;;  %2114 = vset.pattern.permute.xlu2 %v2311_v0 }
  0xce   : > { %vm535_vm14 = vcmp.eq.s32.totalorder %v450_v24, %v2507_v44  ;;  %vm536_vm3 = vcmp.eq.s32.totalorder %v450_v24, %v2512_v48  ;;  %482 = vperm.xlu2 %2114, %v246_v23  }
  0xcf   : > { %vm599_vm2 = vmor %vm375_vm1, %vm535_vm14 }
  0xd0   : > { %v2660_v25 = vpop.permute.xlu2 %346  ;;  %vm600_vm8 = vmor %vm376_vm7, %vm536_vm3 }
  0xd1   : > { %vm1893_vm13 = vmpackc.low %vm599_vm2, %vm597_vm9  ;;  %vm537_vm9 = vcmp.eq.s32.totalorder %v453_v26, %v2507_v44 }
  0xd2   : > { %vm1925_vm14 = vmpackc.low %vm600_vm8, %vm598_vm11  ;;  %vm538_vm11 = vcmp.eq.s32.totalorder %v453_v26, %v2512_v48 }
  0xd4   : > { %328 = vperm.xlu1 %2113, %v2596_v11  }
  0xd6   : > { %1894 = vmatmul.msk.bf16.gmra.mxu0 %vm1893_vm13, %v2313_v53  ;;  %v344_v28 = vpop.permute.xlu1 %343  ;;  %2115 = vset.pattern.permute.xlu2 %v2312_v1  ;;  %v2009_v1 = vld [vmem:[%s3301_s3 + $0x38] sm:$0xff] }
  0xd7   : > { %vm411_vm1 = vcmp.eq.s32.totalorder %v344_v28, %v2507_v44  ;;  %vm412_vm5 = vcmp.eq.s32.totalorder %v344_v28, %v2512_v48  ;;  %v350_v30 = vpop.permute.xlu0 %349  ;;  %331 = vperm.xlu2 %2115, %v249_v31   ;;  %1231 = vmatpush.bf16.msra.mxu2 %v2009_v1 }
  0xd8   : > { %1926 = vmatmul.msk.bf16.gmra.mxu1 %vm1925_vm14, %v2313_v53  ;;  %vm635_vm4 = vmor %vm411_vm1, %vm571_vm6  ;;  %vm416_vm8 = vcmp.eq.s32.totalorder %v350_v30, %v2512_v48  ;;  %2027 = vmatpush.bf16.msra.mxu3 %v2009_v1  ;;  %vm379_vm14 = vcmp.eq.s32.totalorder %v2649_v22, %v2507_v44 }
  0xd9   : > { %vm1911_vm3 = vmpackc.low %vm635_vm4, %vm3327_vm0  ;;  %v510_v29 = vpop.permute.xlu2 %509 }
  0xda   : > { %1912 = vmatmul.msk.bf16.gmra.mxu3 %vm1911_vm3, %v2313_v53  ;;  %vm576_vm13 = vcmp.eq.s32.totalorder %v510_v29, %v2512_v48  ;;  %vm2688_vm2 = vmor %vm412_vm5, %vm572_vm15 }
  0xdb   : > { %vm2697_vm10 = vmor %vm416_vm8, %vm576_vm13  ;;  %1232 = vmatpush.bf16.msra.mxu2 %v2008_v36  ;;  %vm380_vm13 = vcmp.eq.s32.totalorder %v2649_v22, %v2512_v48 }
  0xdc   : > { %2116 = vset.pattern.permute.xlu1 %v2311_v0  ;;  %v3332_v33 = vsel %vm2697_vm10, 4294967295, %v3331_v33  ;;  %2028 = vmatpush.bf16.msra.mxu3 %v2008_v36 }
  0xdd   : > { %491 = vperm.xlu1 %2116, %v249_v31  }
  0xde   : > { %v293_v34 = vpop.permute.xlu1 %292 }
  0xdf   : > { %vm377_vm5 = vcmp.eq.s32.totalorder %v293_v34, %v2507_v44  ;;  %vm378_vm12 = vcmp.eq.s32.totalorder %v293_v34, %v2512_v48  ;;  %1233 = vmatpush.bf16.msra.mxu2 %v2007_v38 }
  0xe0   : > { %vm601_vm6 = vmor %vm377_vm5, %vm537_vm9  ;;  %vm575_vm9 = vcmp.eq.s32.totalorder %v510_v29, %v2507_v44  ;;  %2029 = vmatpush.bf16.msra.mxu3 %v2007_v38  ;;  %v459_v49 = vpop.permute.xlu0 %458 }
  0xe1   : > { %vm602_vm0 = vmor %vm378_vm12, %vm538_vm11  ;;  %vm415_vm12 = vcmp.eq.s32.totalorder %v350_v30, %v2507_v44 }
  0xe2   : > { %v2701_v35 = vpop.permute.xlu2 %301 }
  0xe3   : > { %1234 = vmatpush.bf16.msra.mxu2 %v2006_v39  ;;  %vm384_vm7 = vcmp.eq.s32.totalorder %v2701_v35, %v2512_v48 }
  0xe4   : > { %2030 = vmatpush.bf16.msra.mxu3 %v2006_v39 }
  0xe7   : > { %v456_v0 = vpop.permute.xlu1 %455  ;;  %1235 = vmatpush.bf16.msra.mxu2 %v2005_v43 }
  0xe8   : > { %vm539_vm1 = vcmp.eq.s32.totalorder %v456_v0, %v2507_v44  ;;  %vm540_vm15 = vcmp.eq.s32.totalorder %v456_v0, %v2512_v48  ;;  %2031 = vmatpush.bf16.msra.mxu3 %v2005_v43  ;;  %v516_v54 = vpop.permute.xlu0 %515 }
  0xe9   : > { %vm603_vm3 = vmor %vm379_vm14, %vm539_vm1  ;;  %vm413_vm14 = vcmp.eq.s32.totalorder %v2660_v25, %v2507_v44 }
  0xea   : > { %vm1895_vm8 = vmpackc.low %vm603_vm3, %vm601_vm6  ;;  %v2719_v37 = vpop.permute.xlu2 %352 }
  0xeb   : > { %1896 = vmatmul.msk.bf16.gmra.mxu0 %vm1895_vm8, %v2313_v53  ;;  %vm604_vm5 = vmor %vm380_vm13, %vm540_vm15  ;;  %1236 = vmatpush.bf16.msra.mxu2 %v2004_v47  ;;  %vm417_vm10 = vcmp.eq.s32.totalorder %v2719_v37, %v2507_v44 }
  0xec   : > { %vm1927_vm11 = vmpackc.low %vm604_vm5, %vm602_vm0  ;;  %vm414_vm0 = vcmp.eq.s32.totalorder %v2660_v25, %v2512_v48  ;;  %vm418_vm5 = vcmp.eq.s32.totalorder %v2719_v37, %v2512_v48  ;;  %2032 = vmatpush.bf16.msra.mxu3 %v2004_v47 }
  0xed   : > { %1928 = vmatmul.msk.bf16.gmra.mxu1 %vm1927_vm11, %v2313_v53  ;;  %vm639_vm6 = vmor %vm415_vm12, %vm575_vm9 }
  0xef   : > { %v507_v40 = vpop.permute.xlu1 %506  ;;  %1237 = vmatpush.bf16.msra.mxu2 %v2003_v50 }
  0xf0   : > { %vm573_vm1 = vcmp.eq.s32.totalorder %v507_v40, %v2507_v44  ;;  %vm574_vm15 = vcmp.eq.s32.totalorder %v507_v40, %v2512_v48  ;;  %2033 = vmatpush.bf16.msra.mxu3 %v2003_v50  ;;  %v465_v62 = vpop.permute.xlu0 %464 }
  0xf1   : > { %vm637_vm3 = vmor %vm413_vm14, %vm573_vm1  ;;  %vm542_vm1 = vcmp.eq.s32.totalorder %v459_v49, %v2512_v48 }
  0xf2   : > { %vm1913_vm13 = vmpackc.low %vm639_vm6, %vm637_vm3  ;;  %vm541_vm6 = vcmp.eq.s32.totalorder %v459_v49, %v2507_v44 }
  0xf3   : > { %1914 = vmatmul.msk.bf16.gmra.mxu3 %vm1913_vm13, %v2313_v53  ;;  %vm2738_vm8 = vmor %vm414_vm0, %vm574_vm15  ;;  %vm383_vm0 = vcmp.eq.s32.totalorder %v2701_v35, %v2507_v44  ;;  %1238 = vmatpush.bf16.msra.mxu2 %v2002_v52 }
  0xf4   : > { %v3334_v41 = vsel %vm2738_vm8, 4294967295, %v3333_v41  ;;  %v513_v42 = vpop.permute.xlu2 %512  ;;  %2034 = vmatpush.bf16.msra.mxu3 %v2002_v52 }
  0xf5   : > { %vm578_vm12 = vcmp.eq.s32.totalorder %v513_v42, %v2512_v48  ;;  %vm577_vm4 = vcmp.eq.s32.totalorder %v513_v42, %v2507_v44 }
  0xf6   : > { %vm2752_vm11 = vmor %vm418_vm5, %vm578_vm12 }
  0xf7   : > { %v3336_v45 = vsel %vm2752_vm11, 4294967295, %v3335_v45 }
  0xf8   : > { %v299_v46 = vpop.permute.xlu1 %298 }
  0xf9   : > { %vm381_vm14 = vcmp.eq.s32.totalorder %v299_v46, %v2507_v44  ;;  %vm382_vm15 = vcmp.eq.s32.totalorder %v299_v46, %v2512_v48  ;;  %v314_v14 = vpop.permute.xlu0 %313 }
  0xfa   : > { %vm605_vm3 = vmor %vm381_vm14, %vm541_vm6 }
  0xfb   : > { %vm606_vm12 = vmor %vm382_vm15, %vm542_vm1  ;;  %vm579_vm1 = vcmp.eq.s32.totalorder %v516_v54, %v2507_v44 }
  0xfd   : > { %v308_v56 = vpop.permute.xlu2 %307 }
 0x101   : > { %v462_v51 = vpop.permute.xlu1 %461 }
 0x102   : > { %vm543_vm13 = vcmp.eq.s32.totalorder %v462_v51, %v2507_v44  ;;  %vm544_vm5 = vcmp.eq.s32.totalorder %v462_v51, %v2512_v48  ;;  %v477_v30 = vpop.permute.xlu0 %476 }
 0x103   : > { %vm607_vm9 = vmor %vm383_vm0, %vm543_vm13 }
 0x104   : > { %vm1897_vm8 = vmpackc.low %vm607_vm9, %vm605_vm3 }
 0x105   : > { %1898 = vmatmul.msk.bf16.gmra.mxu0 %vm1897_vm8, %v2313_v53  ;;  %vm608_vm6 = vmor %vm384_vm7, %vm544_vm5  ;;  %vm580_vm7 = vcmp.eq.s32.totalorder %v516_v54, %v2512_v48  ;;  %v311_v3 = vpop.permute.xlu2 %310  ;;  %vm3340_vm5 = vnez %v3322_v16 }
 0x106   : > { %vm1929_vm14 = vmpackc.low %vm608_vm6, %vm606_vm12  ;;  %vm545_vm12 = vcmp.eq.s32.totalorder %v465_v62, %v2507_v44  ;;  %vm387_vm6 = vcmp.eq.s32.totalorder %v308_v56, %v2507_v44 }
 0x107   : > { %1930 = vmatmul.msk.bf16.gmra.mxu1 %vm1929_vm14, %v2313_v53  ;;  %vm641_vm9 = vmor %vm417_vm10, %vm577_vm4  ;;  %vm546_vm14 = vcmp.eq.s32.totalorder %v465_v62, %v2512_v48 }
 0x10a   : > { %v356_v55 = vpop.permute.xlu1 %355 }
 0x10b   : > { %vm419_vm15 = vcmp.eq.s32.totalorder %v356_v55, %v2507_v44  ;;  %vm420_vm0 = vcmp.eq.s32.totalorder %v356_v55, %v2512_v48  ;;  %v486_v49 = vpop.permute.xlu0 %485 }
 0x10c   : > { %vm643_vm3 = vmor %vm419_vm15, %vm579_vm1  ;;  %vm388_vm1 = vcmp.eq.s32.totalorder %v308_v56, %v2512_v48 }
 0x10d   : > { %vm1915_vm8 = vmpackc.low %vm643_vm3, %vm641_vm9 }
 0x10e   : > { %1916 = vmatmul.msk.bf16.gmra.mxu3 %vm1915_vm8, %v2313_v53  ;;  %vm2785_vm13 = vmor %vm420_vm0, %vm580_vm7  ;;  %vm3339_vm8 = vnez %v3316_v2  ;;  %v474_v13 = vpop.permute.xlu2 %473 }
 0x10f   : > { %v3338_v57 = vsel %vm2785_vm13, 4294967295, %v3337_v57  ;;  %vm3341_vm11 = vmpackc.low %vm3339_vm8, %vm3340_vm5  ;;  %vm389_vm5 = vcmp.eq.s32.totalorder %v311_v3, %v2507_v44 }
 0x112   : > { %v305_v58 = vpop.permute.xlu1 %304 }
 0x113   : > { %v946_v59 = vpop.f32.mrf.mxu0  ;;  %vm385_vm4 = vcmp.eq.s32.totalorder %v305_v58, %v2507_v44  ;;  %vm386_vm10 = vcmp.eq.s32.totalorder %v305_v58, %v2512_v48 }
 0x114   : > { %v947_v63 = vadd.f32 %v2796_v60, %v946_v59  ;;  %vm609_vm15 = vmor %vm385_vm4, %vm545_vm12 }
 0x115   : > { %v1035_v61 = vpop.f32.mrf.mxu1  ;;  %vm610_vm3 = vmor %vm386_vm10, %vm546_vm14  ;;  %vm551_vm10 = vcmp.eq.s32.totalorder %v474_v13, %v2507_v44  ;;  %vm392_vm14 = vcmp.eq.s32.totalorder %v314_v14, %v2512_v48 }
 0x116   : > { %v1036_v6 = vadd.f32 %v1035_v61, %v947_v63 }
 0x117   : > { %v320_v26 = vpop.permute.xlu2 %319 }
 0x118   : > { %v1115_v10 = vmax.f32 %v1036_v6, 0.0 }
 0x11b   : > { %v948_v4 = vpop.f32.mrf.mxu0  ;;  %v468_v5 = vpop.permute.xlu1 %467 }
 0x11c   : > { %v949_v7 = vadd.f32 %v2796_v60, %v948_v4  ;;  %vm547_vm0 = vcmp.eq.s32.totalorder %v468_v5, %v2507_v44  ;;  %vm548_vm9 = vcmp.eq.s32.totalorder %v468_v5, %v2512_v48 }
 0x11d   : > { %v1037_v8 = vpop.f32.mrf.mxu1  ;;  %vm611_vm7 = vmor %vm387_vm6, %vm547_vm0  ;;  %vm552_vm6 = vcmp.eq.s32.totalorder %v474_v13, %v2512_v48 }
 0x11e   : > { %v1038_v9 = vadd.f32 %v1037_v8, %v949_v7  ;;  %1942 = vmatmul.msk.bf16.vlgmr.msrb.gmra.mxu3 %vm3341_vm11, %v2313_v53  ;;  %vm1899_vm13 = vmpackc.low %vm611_vm7, %vm609_vm15  ;;  %vm391_vm11 = vcmp.eq.s32.totalorder %v314_v14, %v2507_v44 }
 0x11f   : > { %1900 = vmatmul.msk.bf16.gmra.mxu0 %vm1899_vm13, %v2313_v53  ;;  %vm612_vm4 = vmor %vm388_vm1, %vm548_vm9  ;;  %vm390_vm1 = vcmp.eq.s32.totalorder %v311_v3, %v2512_v48  ;;  %v323_v35 = vpop.permute.xlu2 %322  ;;  %v489_v3 = vpop.permute.xlu0 %488 }
 0x120   : > { %v1116_v11 = vmax.f32 %v1038_v9, 0.0  ;;  %vm1931_vm12 = vmpackc.low %vm612_vm4, %vm610_vm3  ;;  %vm3344_vm4 = vnez %v3324_v19 }
 0x121   : > { %1932 = vmatmul.msk.bf16.gmra.mxu1 %vm1931_vm12, %v2313_v53  ;;  %vm615_vm0 = vmor %vm391_vm11, %vm551_vm10 }
 0x122   : > { %v1147_v12 = vpack.c.bf16 %v1116_v11, %v1115_v10  ;;  %vm2825_vm3 = vmor %vm392_vm14, %vm552_vm6  ;;  %vm554_vm14 = vcmp.eq.s32.totalorder %v477_v30, %v2512_v48 }
 0x123   : > { %v951_v15 = vpop.f32.mrf.mxu0  ;;  %v471_v17 = vpop.permute.xlu1 %470  ;;  %vm3345_vm12 = vmpackc.low %vm2688_vm2, %vm3344_vm4  ;;  %vm553_vm2 = vcmp.eq.s32.totalorder %v477_v30, %v2507_v44  ;;  %vm3346_vm4 = vnez %v3332_v33 }
 0x124   : > { %1239 = vmatmul.bf16.vlgmr.msra.gmra.mxu2 %v1147_v12  ;;  %vm549_vm13 = vcmp.eq.s32.totalorder %v471_v17, %v2507_v44  ;;  %v952_v16 = vadd.f32 %v2796_v60, %v951_v15  ;;  %vm550_vm15 = vcmp.eq.s32.totalorder %v471_v17, %v2512_v48 }
 0x125   : > { %v1040_v2 = vpop.f32.mrf.mxu1  ;;  %vm613_vm9 = vmor %vm389_vm5, %vm549_vm13  ;;  %vm395_vm5 = vcmp.eq.s32.totalorder %v320_v26, %v2507_v44 }
 0x126   : > { %vm614_vm7 = vmor %vm390_vm1, %vm550_vm15  ;;  %v1041_v21 = vadd.f32 %v1040_v2, %v952_v16  ;;  %vm396_vm1 = vcmp.eq.s32.totalorder %v320_v26, %v2512_v48 }
 0x127   : > { %vm1901_vm8 = vmpackc.low %vm615_vm0, %vm613_vm9 }
 0x128   : > { %vm1933_vm10 = vmpackc.low %vm2825_vm3, %vm614_vm7  ;;  %v1117_v27 = vmax.f32 %v1041_v21, 0.0  ;;  %v483_v46 = vpop.permute.xlu2 %482 }
 0x12b   : > { %v953_v20 = vpop.f32.mrf.mxu0 }
 0x12c   : > { %v954_v22 = vadd.f32 %v2796_v60, %v953_v20  ;;  %v317_v23 = vpop.permute.xlu1 %316 }
 0x12d   : > { %v1042_v24 = vpop.f32.mrf.mxu1  ;;  %vm393_vm11 = vcmp.eq.s32.totalorder %v317_v23, %v2507_v44  ;;  %vm394_vm6 = vcmp.eq.s32.totalorder %v317_v23, %v2512_v48 }
 0x12e   : > { %v1043_v25 = vadd.f32 %v1042_v24, %v954_v22  ;;  %1944 = vmatmul.msk.bf16.gmra.mxu3 %vm3345_vm12, %v2313_v53  ;;  %vm617_vm0 = vmor %vm393_vm11, %vm553_vm2  ;;  %vm3347_vm12 = vnez %v3334_v41  ;;  %vm397_vm11 = vcmp.eq.s32.totalorder %v323_v35, %v2507_v44 }
 0x12f   : > { %1902 = vmatmul.msk.bf16.gmra.mxu0 %vm1901_vm8, %v2313_v53  ;;  %vm618_vm3 = vmor %vm394_vm6, %vm554_vm14  ;;  %vm559_vm6 = vcmp.eq.s32.totalorder %v486_v49, %v2507_v44  ;;  %vm398_vm14 = vcmp.eq.s32.totalorder %v323_v35, %v2512_v48 }
 0x130   : > { %v1118_v28 = vmax.f32 %v1043_v25, 0.0 }
 0x131   : > { %1934 = vmatmul.msk.bf16.gmra.mxu1 %vm1933_vm10, %v2313_v53  ;;  %vm3348_vm10 = vmpackc.low %vm3346_vm4, %vm3347_vm12  ;;  %vm3349_vm12 = vnez %v3338_v57  ;;  %v332_v63 = vpop.permute.xlu2 %331 }
 0x132   : > { %v1148_v29 = vpack.c.bf16 %v1118_v28, %v1117_v27 }
 0x133   : > { %v956_v31 = vpop.f32.mrf.mxu0 }
 0x134   : > { %1244 = vmatmul.bf16.gmra.mxu2 %v1148_v29  ;;  %v957_v32 = vadd.f32 %v2796_v60, %v956_v31 }
 0x135   : > { %v1045_v34 = vpop.f32.mrf.mxu1  ;;  %v480_v19 = vpop.permute.xlu1 %479 }
 0x136   : > { %vm555_vm13 = vcmp.eq.s32.totalorder %v480_v19, %v2507_v44  ;;  %vm556_vm15 = vcmp.eq.s32.totalorder %v480_v19, %v2512_v48  ;;  %v1046_v0 = vadd.f32 %v1045_v34, %v957_v32 }
 0x137   : > { %vm619_vm9 = vmor %vm395_vm5, %vm555_vm13  ;;  %vm557_vm5 = vcmp.eq.s32.totalorder %v483_v46, %v2507_v44 }
 0x138   : > { %vm620_vm7 = vmor %vm396_vm1, %vm556_vm15  ;;  %v1119_v39 = vmax.f32 %v1046_v0, 0.0  ;;  %vm558_vm1 = vcmp.eq.s32.totalorder %v483_v46, %v2512_v48  ;;  %v2906_v46 = vld [vmem:[%s3302_s4] ss:$0 sm:$0xff] }
 0x139   : > { %vm1903_vm8 = vmpackc.low %vm619_vm9, %vm617_vm0  ;;  %vm560_vm0 = vcmp.eq.s32.totalorder %v486_v49, %v2512_v48 }
 0x13a   : > { %vm1935_vm2 = vmpackc.low %vm620_vm7, %vm618_vm3 }
 0x13b   : > { %v958_v1 = vpop.f32.mrf.mxu0  ;;  %vm621_vm9 = vmor %vm397_vm11, %vm557_vm5 }
 0x13c   : > { %v959_v36 = vadd.f32 %v2796_v60, %v958_v1  ;;  %vm622_vm7 = vmor %vm398_vm14, %vm558_vm1 }
 0x13d   : > { %v1047_v37 = vpop.f32.mrf.mxu1 }
 0x13e   : > { %v1048_v38 = vadd.f32 %v1047_v37, %v959_v36  ;;  %1946 = vmatmul.msk.bf16.gmra.mxu3 %vm3348_vm10, %v2313_v53  ;;  %v326_v42 = vpop.permute.xlu1 %325  ;;  %vm3350_vm10 = vnez %v3336_v45 }
 0x13f   : > { %1904 = vmatmul.msk.bf16.gmra.mxu0 %vm1903_vm8, %v2313_v53  ;;  %vm399_vm13 = vcmp.eq.s32.totalorder %v326_v42, %v2507_v44  ;;  %vm400_vm15 = vcmp.eq.s32.totalorder %v326_v42, %v2512_v48 }
 0x140   : > { %v1120_v40 = vmax.f32 %v1048_v38, 0.0  ;;  %vm623_vm3 = vmor %vm399_vm13, %vm559_vm6  ;;  %vm561_vm13 = vcmp.eq.s32.totalorder %v489_v3, %v2507_v44  ;;  %vm403_vm6 = vcmp.eq.s32.totalorder %v332_v63, %v2507_v44 }
 0x141   : > { %1936 = vmatmul.msk.bf16.gmra.mxu1 %vm1935_vm2, %v2313_v53  ;;  %vm624_vm8 = vmor %vm400_vm15, %vm560_vm0  ;;  %vm562_vm15 = vcmp.eq.s32.totalorder %v489_v3, %v2512_v48  ;;  %vm404_vm0 = vcmp.eq.s32.totalorder %v332_v63, %v2512_v48 }
 0x142   : > { %v1149_v43 = vpack.c.bf16 %v1120_v40, %v1119_v39  ;;  %vm1905_vm4 = vmpackc.low %vm623_vm3, %vm621_vm9 }
 0x143   : > { %v961_v47 = vpop.f32.mrf.mxu0  ;;  %vm3351_vm2 = vmpackc.low %vm3349_vm12, %vm3350_vm10  ;;  %v1006_v57 = vpop.f32.mrf.mxu3 }
 0x144   : > { %1249 = vmatmul.bf16.gmra.mxu2 %v1149_v43  ;;  %v962_v33 = vadd.f32 %v2796_v60, %v961_v47  ;;  %vm1937_vm5 = vmpackc.low %vm624_vm8, %vm622_vm7 }
 0x145   : > { %v1050_v50 = vpop.f32.mrf.mxu1 }
 0x146   : > { %v329_v51 = vpop.permute.xlu1 %328  ;;  %v1051_v52 = vadd.f32 %v1050_v50, %v962_v33  ;;  %v1007_v50 = vadd.f32 %v2796_v60, %v1006_v57 }
 0x147   : > { %vm401_vm11 = vcmp.eq.s32.totalorder %v329_v51, %v2507_v44  ;;  %vm402_vm1 = vcmp.eq.s32.totalorder %v329_v51, %v2512_v48 }
 0x148   : > { %v1121_v58 = vmax.f32 %v1051_v52, 0.0  ;;  %vm625_vm3 = vmor %vm401_vm11, %vm561_vm13 }
 0x149   : > { %vm626_vm8 = vmor %vm402_vm1, %vm562_vm15 }
 0x14b   : > { %v963_v41 = vpop.f32.mrf.mxu0  ;;  %v1008_v12 = vpop.f32.mrf.mxu3 }
 0x14c   : > { %v964_v54 = vadd.f32 %v2796_v60, %v963_v41  ;;  %v1009_v52 = vadd.f32 %v2796_v60, %v1008_v12 }
 0x14d   : > { %v1052_v55 = vpop.f32.mrf.mxu1 }
 0x14e   : > { %v1053_v56 = vadd.f32 %v1052_v55, %v964_v54  ;;  %1948 = vmatmul.msk.bf16.gmra.mxu3 %vm3351_vm2, %v2313_v53 }
 0x14f   : > { %1906 = vmatmul.msk.bf16.gmra.mxu0 %vm1905_vm4, %v2313_v53  ;;  %v492_v5 = vpop.permute.xlu1 %491 }
 0x150   : > { %v1122_v59 = vmax.f32 %v1053_v56, 0.0  ;;  %vm563_vm14 = vcmp.eq.s32.totalorder %v492_v5, %v2507_v44  ;;  %vm564_vm9 = vcmp.eq.s32.totalorder %v492_v5, %v2512_v48 }
 0x151   : > { %1938 = vmatmul.msk.bf16.gmra.mxu1 %vm1937_vm5, %v2313_v53  ;;  %vm627_vm7 = vmor %vm403_vm6, %vm563_vm14 }
 0x152   : > { %v1150_v61 = vpack.c.bf16 %v1122_v59, %v1121_v58  ;;  %vm628_vm4 = vmor %vm404_vm0, %vm564_vm9 }
 0x153   : > { %v966_v62 = vpop.f32.mrf.mxu0  ;;  %vm1907_vm12 = vmpackc.low %vm627_vm7, %vm625_vm3 }
 0x154   : > { %1254 = vmatmul.bf16.gmra.mxu2 %v1150_v61  ;;  %v967_v45 = vadd.f32 %v2796_v60, %v966_v62  ;;  %vm1939_vm10 = vmpackc.low %vm628_vm4, %vm626_vm8 }
 0x155   : > { %v1055_v4 = vpop.f32.mrf.mxu1 }
 0x156   : > { %v1056_v7 = vadd.f32 %v1055_v4, %v967_v45 }
 0x158   : > { %v1123_v44 = vmax.f32 %v1056_v7, 0.0 }
 0x15b   : > { %v968_v6 = vpop.f32.mrf.mxu0 }
 0x15c   : > { %v969_v8 = vadd.f32 %v2796_v60, %v968_v6 }
 0x15d   : > { %v1057_v9 = vpop.f32.mrf.mxu1  ;;  %v2888_v15 = vpop.f32.mrf.mxu3 }
 0x15e   : > { %v1058_v10 = vadd.f32 %v1057_v9, %v969_v8 }
 0x15f   : > { %1908 = vmatmul.msk.bf16.gmra.mxu0 %vm1907_vm12, %v2313_v53 }
 0x160   : > { %v1124_v11 = vmax.f32 %v1058_v10, 0.0 }
 0x161   : > { %1940 = vmatmul.msk.bf16.gmra.mxu1 %vm1939_vm10, %v2313_v53 }
 0x162   : > { %v1151_v48 = vpack.c.bf16 %v1124_v11, %v1123_v44  ;;  %v1012_v11 = vadd.f32 %v2796_v60, %v2888_v15 }
 0x164   : > { %1259 = vmatmul.bf16.gmra.mxu2 %v1151_v48 }
 0x165   : > { %v1013_v24 = vpop.f32.mrf.mxu3 }
 0x168   : > { %v971_v13 = vpop.f32.mrf.mxu0 }
 0x169   : > { %v972_v17 = vadd.f32 %v2796_v60, %v971_v13 }
 0x16a   : > { %v1060_v14 = vpop.f32.mrf.mxu1 }
 0x16b   : > { %v1061_v16 = vadd.f32 %v1060_v14, %v972_v17  ;;  %v1014_v17 = vadd.f32 %v2796_v60, %v1013_v24 }
 0x16d   : > { %v1125_v22 = vmax.f32 %v1061_v16, 0.0 }
 0x170   : > { %v973_v2 = vpop.f32.mrf.mxu0 }
 0x171   : > { %v974_v18 = vadd.f32 %v2796_v60, %v973_v2 }
 0x172   : > { %v1062_v20 = vpop.f32.mrf.mxu1 }
 0x173   : > { %v1063_v21 = vadd.f32 %v1062_v20, %v974_v18 }
 0x175   : > { %v1126_v23 = vmax.f32 %v1063_v21, 0.0 }
 0x176   : > { %v2892_v53 = vpop.f32.mrf.mxu3 }
 0x177   : > { %v1152_v25 = vpack.c.bf16 %v1126_v23, %v1125_v22 }
 0x179   : > { %1264 = vmatmul.bf16.gmra.mxu2 %v1152_v25 }
 0x17e   : > { %v2895_v29 = vpop.f32.mrf.mxu3 }
 0x182   : > { %v976_v26 = vpop.f32.mrf.mxu0 }
 0x183   : > { %v977_v28 = vadd.f32 %v2796_v60, %v976_v26 }
 0x184   : > { %v1065_v27 = vpop.f32.mrf.mxu1 }
 0x185   : > { %v1066_v31 = vadd.f32 %v1065_v27, %v977_v28 }
 0x187   : > { %v1127_v35 = vmax.f32 %v1066_v31, 0.0 }
 0x18a   : > { %v978_v30 = vpop.f32.mrf.mxu0 }
 0x18b   : > { %v979_v34 = vadd.f32 %v2796_v60, %v978_v30 }
 0x18c   : > { %v1067_v19 = vpop.f32.mrf.mxu1 }
 0x18d   : > { %v1068_v32 = vadd.f32 %v1067_v19, %v979_v34 }
 0x18f   : > { %v1128_v1 = vmax.f32 %v1068_v32, 0.0 }
 0x191   : > { %v2898_v0 = vpop.f32.mrf.mxu3  ;;  %v1153_v36 = vpack.c.bf16 %v1128_v1, %v1127_v35  ;;  %v1017_v35 = vadd.f32 %v2796_v60, %v2892_v53 }
 0x193   : > { %1269 = vmatmul.bf16.gmra.mxu2 %v1153_v36 }
 0x199   : > { %v2900_v37 = vpop.f32.mrf.mxu3 }
 0x19c   : > { %v981_v38 = vpop.f32.mrf.mxu0 }
 0x19d   : > { %v982_v40 = vadd.f32 %v2796_v60, %v981_v38 }
 0x19e   : > { %v1070_v39 = vpop.f32.mrf.mxu1 }
 0x19f   : > { %v1071_v47 = vadd.f32 %v1070_v39, %v982_v40  ;;  %v1019_v40 = vadd.f32 %v2796_v60, %v2895_v29 }
 0x1a1   : > { %v1095_v42 = vpop.f32.mrf.mxu3  ;;  %v1129_v56 = vmax.f32 %v1071_v47, 0.0 }
 0x1a2   : > { %v1096_v54 = vadd.f32 %v1095_v42, %v1007_v50 }
 0x1a4   : > { %v983_v43 = vpop.f32.mrf.mxu0  ;;  %v1139_v63 = vmax.f32 %v1096_v54, 0.0 }
 0x1a5   : > { %v984_v49 = vadd.f32 %v2796_v60, %v983_v43 }
 0x1a6   : > { %v1072_v33 = vpop.f32.mrf.mxu1 }
 0x1a7   : > { %v1073_v41 = vadd.f32 %v1072_v33, %v984_v49  ;;  %v1240_v51 = vpop.f32.mrf.mxu2 }
 0x1a8   : > { %v2912_v55 = vadd.f32 %v2906_v46, %v1240_v51 }
 0x1a9   : > { %v1130_v58 = vmax.f32 %v1073_v41, 0.0  ;;  %v1097_v59 = vpop.f32.mrf.mxu3 }
 0x1aa   : > { %1320 = vmax.xlane.f32.xlu2 %v2912_v55  ;;  %v1098_v61 = vadd.f32 %v1097_v59, %v1009_v52 }
 0x1ab   : > { %v1154_v62 = vpack.c.bf16 %v1130_v58, %v1129_v56 }
 0x1ac   : > { %v1140_v3 = vmax.f32 %v1098_v61, 0.0  ;;  %v986_v4 = vpop.f32.mrf.mxu0 }
 0x1ad   : > { %1274 = vmatmul.bf16.gmra.mxu2 %v1154_v62  ;;  %v987_v57 = vadd.f32 %v2796_v60, %v986_v4 }
 0x1ae   : > { %v1159_v5 = vpack.c.bf16 %v1140_v3, %v1139_v63  ;;  %v1075_v45 = vpop.f32.mrf.mxu1  ;;  %v1022_v3 = vadd.f32 %v2796_v60, %v2898_v0 }
 0x1af   : > { %v1242_v6 = vpop.f32.mrf.mxu2  ;;  %v1076_v9 = vadd.f32 %v1075_v45, %v987_v57 }
 0x1b0   : > { %v2917_v7 = vadd.f32 %v2906_v46, %v1242_v6  ;;  %1299 = vmatmul.bf16.vlgmr.msra.gmra.mxu3 %v1159_v5  ;;  %v1024_v6 = vadd.f32 %v2796_v60, %v2900_v37 }
 0x1b1   : > { %v1100_v8 = vpop.f32.mrf.mxu3  ;;  %v1131_v12 = vmax.f32 %v1076_v9, 0.0 }
 0x1b2   : > { %1322 = vmax.xlane.f32.xlu0 %v2917_v7  ;;  %v1101_v2 = vadd.f32 %v1100_v8, %v1012_v11 }
 0x1b4   : > { %v988_v10 = vpop.f32.mrf.mxu0  ;;  %v1141_v23 = vmax.f32 %v1101_v2, 0.0 }
 0x1b5   : > { %v989_v44 = vadd.f32 %v2796_v60, %v988_v10 }
 0x1b6   : > { %v1077_v48 = vpop.f32.mrf.mxu1 }
 0x1b7   : > { %v1078_v13 = vadd.f32 %v1077_v48, %v989_v44  ;;  %v1245_v14 = vpop.f32.mrf.mxu2 }
 0x1b8   : > { %v2925_v16 = vadd.f32 %v2906_v46, %v1245_v14 }
 0x1b9   : > { %v1132_v18 = vmax.f32 %v1078_v13, 0.0  ;;  %v1102_v20 = vpop.f32.mrf.mxu3 }
 0x1ba   : > { %1324 = vmax.xlane.f32.xlu1 %v2925_v16  ;;  %v1103_v21 = vadd.f32 %v1102_v20, %v1014_v17 }
 0x1bb   : > { %v1155_v22 = vpack.c.bf16 %v1132_v18, %v1131_v12 }
 0x1bc   : > { %v1142_v25 = vmax.f32 %v1103_v21, 0.0  ;;  %v991_v26 = vpop.f32.mrf.mxu0 }
 0x1bd   : > { %1279 = vmatmul.bf16.gmra.mxu2 %v1155_v22  ;;  %v992_v28 = vadd.f32 %v2796_v60, %v991_v26 }
 0x1be   : > { %v1080_v15 = vpop.f32.mrf.mxu1  ;;  %v1160_v27 = vpack.c.bf16 %v1142_v25, %v1141_v23 }
 0x1bf   : > { %v1247_v30 = vpop.f32.mrf.mxu2  ;;  %v1081_v34 = vadd.f32 %v1080_v15, %v992_v28 }
 0x1c0   : > { %v2930_v24 = vadd.f32 %v2906_v46, %v1247_v30  ;;  %1304 = vmatmul.bf16.gmra.mxu3 %v1160_v27 }
 0x1c1   : > { %v1105_v31 = vpop.f32.mrf.mxu3  ;;  %v1133_v36 = vmax.f32 %v1081_v34, 0.0 }
 0x1c2   : > { %1326 = vmax.xlane.f32.xlu2 %v2930_v24  ;;  %v1106_v42 = vadd.f32 %v1105_v31, %v1017_v35 }
 0x1c4   : > { %v993_v19 = vpop.f32.mrf.mxu0  ;;  %v1143_v41 = vmax.f32 %v1106_v42, 0.0 }
 0x1c5   : > { %v994_v32 = vadd.f32 %v2796_v60, %v993_v19 }
 0x1c6   : > { %v1082_v1 = vpop.f32.mrf.mxu1 }
 0x1c7   : > { %v1083_v38 = vadd.f32 %v1082_v1, %v994_v32  ;;  %v1250_v39 = vpop.f32.mrf.mxu2 }
 0x1c8   : > { %v2939_v43 = vadd.f32 %v2906_v46, %v1250_v39 }
 0x1c9   : > { %v1134_v47 = vmax.f32 %v1083_v38, 0.0  ;;  %v1107_v49 = vpop.f32.mrf.mxu3 }
 0x1ca   : > { %1328 = vmax.xlane.f32.xlu2 %v2939_v43  ;;  %v1108_v50 = vadd.f32 %v1107_v49, %v1019_v40 }
 0x1cb   : > { %v1156_v33 = vpack.c.bf16 %v1134_v47, %v1133_v36 }
 0x1cc   : > { %v1144_v51 = vmax.f32 %v1108_v50, 0.0  ;;  %v996_v53 = vpop.f32.mrf.mxu0 }
 0x1cd   : > { %1284 = vmatmul.bf16.gmra.mxu2 %v1156_v33  ;;  %v997_v56 = vadd.f32 %v2796_v60, %v996_v53 }
 0x1ce   : > { %v1085_v52 = vpop.f32.mrf.mxu1  ;;  %v1161_v54 = vpack.c.bf16 %v1144_v51, %v1143_v41 }
 0x1cf   : > { %v1252_v58 = vpop.f32.mrf.mxu2  ;;  %v1086_v61 = vadd.f32 %v1085_v52, %v997_v56 }
 0x1d0   : > { %v2944_v29 = vadd.f32 %v2906_v46, %v1252_v58  ;;  %1309 = vmatmul.bf16.gmra.mxu3 %v1161_v54 }
 0x1d1   : > { %v1110_v59 = vpop.f32.mrf.mxu3  ;;  %v1135_v5 = vmax.f32 %v1086_v61, 0.0 }
 0x1d2   : > { %1330 = vmax.xlane.f32.xlu0 %v2944_v29  ;;  %v1111_v8 = vadd.f32 %v1110_v59, %v1022_v3 }
 0x1d4   : > { %v998_v62 = vpop.f32.mrf.mxu0  ;;  %v1145_v12 = vmax.f32 %v1111_v8, 0.0 }
 0x1d5   : > { %v999_v63 = vadd.f32 %v2796_v60, %v998_v62 }
 0x1d6   : > { %v1087_v4 = vpop.f32.mrf.mxu1 }
 0x1d7   : > { %v1088_v45 = vadd.f32 %v1087_v4, %v999_v63  ;;  %v1255_v57 = vpop.f32.mrf.mxu2 }
 0x1d8   : > { %v2953_v9 = vadd.f32 %v2906_v46, %v1255_v57 }
 0x1d9   : > { %v1136_v10 = vmax.f32 %v1088_v45, 0.0  ;;  %v1112_v44 = vpop.f32.mrf.mxu3 }
 0x1da   : > { %1332 = vmax.xlane.f32.xlu1 %v2953_v9  ;;  %v1113_v11 = vadd.f32 %v1112_v44, %v1024_v6 }
 0x1db   : > { %v1157_v48 = vpack.c.bf16 %v1136_v10, %v1135_v5 }
 0x1dc   : > { %v1146_v13 = vmax.f32 %v1113_v11, 0.0  ;;  %v1001_v0 = vpop.f32.mrf.mxu0 }
 0x1dd   : > { %1289 = vmatmul.bf16.gmra.mxu2 %v1157_v48  ;;  %v1002_v37 = vadd.f32 %v2796_v60, %v1001_v0 }
 0x1de   : > { %v1090_v14 = vpop.f32.mrf.mxu1  ;;  %v1162_v17 = vpack.c.bf16 %v1146_v13, %v1145_v12 }
 0x1df   : > { %v1257_v2 = vpop.f32.mrf.mxu2  ;;  %v1091_v21 = vadd.f32 %v1090_v14, %v1002_v37 }
 0x1e0   : > { %v2957_v18 = vadd.f32 %v2906_v46, %v1257_v2  ;;  %1314 = vmatmul.bf16.gmra.mxu3 %v1162_v17 }
 0x1e1   : > { %v1137_v27 = vmax.f32 %v1091_v21, 0.0 }
 0x1e2   : > { %1334 = vmax.xlane.f32.xlu2 %v2957_v18 }
 0x1e4   : > { %v1003_v20 = vpop.f32.mrf.mxu0 }
 0x1e5   : > { %v1004_v22 = vadd.f32 %v2796_v60, %v1003_v20 }
 0x1e6   : > { %v1092_v23 = vpop.f32.mrf.mxu1 }
 0x1e7   : > { %v1093_v25 = vadd.f32 %v1092_v23, %v1004_v22  ;;  %v1260_v26 = vpop.f32.mrf.mxu2 }
 0x1e8   : > { %v2963_v15 = vadd.f32 %v2906_v46, %v1260_v26 }
 0x1e9   : > { %v1138_v28 = vmax.f32 %v1093_v25, 0.0 }
 0x1ea   : > { %1336 = vmax.xlane.f32.xlu0 %v2963_v15 }
 0x1eb   : > { %v1158_v30 = vpack.c.bf16 %v1138_v28, %v1137_v27 }
 0x1ed   : > { %1294 = vmatmul.bf16.gmra.mxu2 %v1158_v30 }
 0x1ef   : > { %v1262_v31 = vpop.f32.mrf.mxu2 }
 0x1f0   : > { %v2971_v39 = vadd.f32 %v2906_v46, %v1262_v31 }
 0x1fc   : > { %v1265_v34 = vpop.f32.mrf.mxu2 }
 0x1fd   : > { %v2979_v49 = vadd.f32 %v2906_v46, %v1265_v34 }
 0x204   : > { %v1267_v19 = vpop.f32.mrf.mxu2 }
 0x205   : > { %v2987_v41 = vadd.f32 %v2906_v46, %v1267_v19 }
 0x216   : > { %v1270_v32 = vpop.f32.mrf.mxu2 }
 0x217   : > { %v2995_v54 = vadd.f32 %v2906_v46, %v1270_v32 }
 0x21d   : > { %v1321_v63 = vpop.xlane.xlu2 %1320 }
 0x21e   : > { %v1272_v35 = vpop.f32.mrf.mxu2  ;;  %v3011_v3 = vsub.f32 %v2912_v55, %v1321_v63 }
 0x21f   : > { %v3003_v61 = vadd.f32 %v2906_v46, %v1272_v35 }
 0x220   : > { %v1416_v45 = vmul.f32 1.442695, %v3011_v3 }
 0x222   : > { %2119 = vpow2.f32 %v1416_v45 }
 0x225   : > { %v1323_v57 = vpop.xlane.xlu0 %1322 }
 0x226   : > { %v3023_v10 = vsub.f32 %v2917_v7, %v1323_v57 }
 0x228   : > { %v1418_v11 = vmul.f32 1.442695, %v3023_v10  ;;  %v2120_v14 = vpop.eup %2119 }
 0x22a   : > { %2121 = vpow2.f32 %v1418_v11 }
 0x22d   : > { %v1325_v12 = vpop.xlane.xlu1 %1324 }
 0x22e   : > { %v3035_v7 = vsub.f32 %v2925_v16, %v1325_v12 }
 0x230   : > { %v1275_v36 = vpop.f32.mrf.mxu2  ;;  %v1420_v2 = vmul.f32 1.442695, %v3035_v7  ;;  %v2122_v23 = vpop.eup %2121 }
 0x231   : > { %v3015_v6 = vadd.f32 %v2906_v46, %v1275_v36 }
 0x232   : > { %2123 = vpow2.f32 %v1420_v2 }
 0x233   : > { %v1300_v1 = vpop.f32.mrf.mxu3 }
 0x234   : > { %v2967_v60 = vadd.f32 %v2906_v46, %v1300_v1 }
 0x235   : > { %v1327_v55 = vpop.xlane.xlu2 %1326 }
 0x236   : > { %1368 = vmax.xlane.f32.xlu1 %v2967_v60  ;;  %v3038_v17 = vsub.f32 %v2930_v24, %v1327_v55 }
 0x238   : > { %v1277_v42 = vpop.f32.mrf.mxu2  ;;  %v1422_v37 = vmul.f32 1.442695, %v3038_v17  ;;  %v2124_v28 = vpop.eup %2123 }
 0x239   : > { %v3027_v13 = vadd.f32 %v2906_v46, %v1277_v42 }
 0x23a   : > { %2125 = vpow2.f32 %v1422_v37 }
 0x23b   : > { %v1302_v38 = vpop.f32.mrf.mxu3 }
 0x23c   : > { %v2974_v40 = vadd.f32 %v2906_v46, %v1302_v38 }
 0x23d   : > { %v1329_v20 = vpop.xlane.xlu2 %1328 }
 0x23e   : > { %1370 = vmax.xlane.f32.xlu2 %v2974_v40  ;;  %1338 = vmax.xlane.f32.xlu1 %v2971_v39  ;;  %v3050_v16 = vsub.f32 %v2939_v43, %v1329_v20 }
 0x240   : > { %v1280_v51 = vpop.f32.mrf.mxu2  ;;  %v1424_v24 = vmul.f32 1.442695, %v3050_v16  ;;  %v2126_v31 = vpop.eup %2125 }
 0x241   : > { %v3043_v21 = vadd.f32 %v2906_v46, %v1280_v51 }
 0x242   : > { %2127 = vpow2.f32 %v1424_v24 }
 0x243   : > { %v1305_v47 = vpop.f32.mrf.mxu3 }
 0x244   : > { %v2982_v50 = vadd.f32 %v2906_v46, %v1305_v47 }
 0x245   : > { %v1331_v26 = vpop.xlane.xlu0 %1330 }
 0x246   : > { %1372 = vmax.xlane.f32.xlu0 %v2982_v50  ;;  %1340 = vmax.xlane.f32.xlu2 %v2979_v49  ;;  %v3059_v43 = vsub.f32 %v2944_v29, %v1331_v26 }
 0x248   : > { %v1282_v58 = vpop.f32.mrf.mxu2  ;;  %v1426_v32 = vmul.f32 1.442695, %v3059_v43  ;;  %v2128_v38 = vpop.eup %2127 }
 0x249   : > { %v3046_v25 = vadd.f32 %v2906_v46, %v1282_v58 }
 0x24a   : > { %2129 = vpow2.f32 %v1426_v32 }
 0x24b   : > { %v1307_v33 = vpop.f32.mrf.mxu3 }
 0x24c   : > { %v2990_v53 = vadd.f32 %v2906_v46, %v1307_v33 }
 0x24d   : > { %v1333_v30 = vpop.xlane.xlu1 %1332 }
 0x24e   : > { %1342 = vmax.xlane.f32.xlu0 %v2987_v41  ;;  %1374 = vmax.xlane.f32.xlu1 %v2990_v53  ;;  %v3062_v19 = vsub.f32 %v2953_v9, %v1333_v30 }
 0x250   : > { %v1285_v4 = vpop.f32.mrf.mxu2  ;;  %v1428_v35 = vmul.f32 1.442695, %v3062_v19 }
 0x251   : > { %v3055_v27 = vadd.f32 %v2906_v46, %v1285_v4 }
 0x252   : > { %2131 = vpow2.f32 %v1428_v35 }
 0x253   : > { %v1310_v52 = vpop.f32.mrf.mxu3 }
 0x254   : > { %v2998_v56 = vadd.f32 %v2906_v46, %v1310_v52  ;;  %v2130_v52 = vpop.eup %2129 }
 0x255   : > { %v1335_v1 = vpop.xlane.xlu2 %1334 }
 0x256   : > { %1376 = vmax.xlane.f32.xlu2 %v2998_v56  ;;  %1344 = vmax.xlane.f32.xlu1 %v2995_v54  ;;  %v3074_v29 = vsub.f32 %v2957_v18, %v1335_v1 }
 0x258   : > { %v1287_v44 = vpop.f32.mrf.mxu2  ;;  %v1430_v47 = vmul.f32 1.442695, %v3074_v29  ;;  %v2132_v58 = vpop.eup %2131 }
 0x259   : > { %v3067_v36 = vadd.f32 %v2906_v46, %v1287_v44 }
 0x25a   : > { %2133 = vpow2.f32 %v1430_v47 }
 0x25b   : > { %v1312_v59 = vpop.f32.mrf.mxu3 }
 0x25c   : > { %v3006_v62 = vadd.f32 %v2906_v46, %v1312_v59 }
 0x25d   : > { %v1337_v33 = vpop.xlane.xlu0 %1336 }
 0x25e   : > { %1378 = vmax.xlane.f32.xlu0 %v3006_v62  ;;  %1346 = vmax.xlane.f32.xlu2 %v3003_v61  ;;  %v3083_v59 = vsub.f32 %v2963_v15, %v1337_v33 }
 0x260   : > { %v1290_v22 = vpop.f32.mrf.mxu2  ;;  %v1432_v63 = vmul.f32 1.442695, %v3083_v59 }
 0x261   : > { %v3070_v42 = vadd.f32 %v2906_v46, %v1290_v22 }
 0x262   : > { %2135 = vpow2.f32 %v1432_v63 }
 0x263   : > { %v1315_v5 = vpop.f32.mrf.mxu3 }
 0x264   : > { %v3018_v8 = vadd.f32 %v2906_v46, %v1315_v5  ;;  %v2134_v5 = vpop.eup %2133 }
 0x266   : > { %1380 = vmax.xlane.f32.xlu1 %v3018_v8  ;;  %1348 = vmax.xlane.f32.xlu0 %v3015_v6 }
 0x268   : > { %v1292_v34 = vpop.f32.mrf.mxu2  ;;  %v2136_v57 = vpop.eup %2135 }
 0x269   : > { %v3079_v51 = vadd.f32 %v2906_v46, %v1292_v34 }
 0x26b   : > { %v1317_v48 = vpop.f32.mrf.mxu3 }
 0x26c   : > { %v3030_v0 = vadd.f32 %v2906_v46, %v1317_v48 }
 0x26e   : > { %1382 = vmax.xlane.f32.xlu2 %v3030_v0  ;;  %1350 = vmax.xlane.f32.xlu1 %v3027_v13 }
 0x26f   : > { %1480 = vadd.xlane.f32.xlu0 %v2120_v14 }
 0x270   : > { %v1295_v9 = vpop.f32.mrf.mxu2 }
 0x271   : > { %v3087_v4 = vadd.f32 %v2906_v46, %v1295_v9 }
 0x276   : > { %1352 = vmax.xlane.f32.xlu2 %v3043_v21  ;;  %1482 = vadd.xlane.f32.xlu1 %v2122_v23 }
 0x277   : > { %1354 = vmax.xlane.f32.xlu0 %v3046_v25 }
 0x278   : > { %v1297_v18 = vpop.f32.mrf.mxu2 }
 0x279   : > { %v3090_v45 = vadd.f32 %v2906_v46, %v1297_v18 }
 0x27e   : > { %1484 = vadd.xlane.f32.xlu2 %v2124_v28  ;;  %1356 = vmax.xlane.f32.xlu1 %v3055_v27 }
 0x27f   : > { %1486 = vadd.xlane.f32.xlu0 %v2126_v31 }
 0x286   : > { %1358 = vmax.xlane.f32.xlu2 %v3067_v36  ;;  %1488 = vadd.xlane.f32.xlu1 %v2128_v38 }
 0x287   : > { %1360 = vmax.xlane.f32.xlu0 %v3070_v42 }
 0x28e   : > { %1362 = vmax.xlane.f32.xlu1 %v3079_v51  ;;  %1490 = vadd.xlane.f32.xlu2 %v2130_v52 }
 0x28f   : > { %1492 = vadd.xlane.f32.xlu0 %v2132_v58 }
 0x296   : > { %1494 = vadd.xlane.f32.xlu1 %v2134_v5  ;;  %1364 = vmax.xlane.f32.xlu2 %v3087_v4 }
 0x297   : > { %1366 = vmax.xlane.f32.xlu0 %v3090_v45 }
 0x29e   : > { %1496 = vadd.xlane.f32.xlu2 %v2136_v57 }
 0x2a9   : > { %v1369_v15 = vpop.xlane.xlu1 %1368 }
 0x2aa   : > { %v3095_v55 = vsub.f32 %v2967_v60, %v1369_v15 }
 0x2ac   : > { %v1464_v44 = vmul.f32 1.442695, %v3095_v55 }
 0x2ae   : > { %2137 = vpow2.f32 %v1464_v44 }
 0x2b1   : > { %v1371_v11 = vpop.xlane.xlu2 %1370  ;;  %v1339_v48 = vpop.xlane.xlu1 %1338 }
 0x2b2   : > { %v3099_v46 = vsub.f32 %v2974_v40, %v1371_v11  ;;  %v3102_v12 = vsub.f32 %v2971_v39, %v1339_v48 }
 0x2b4   : > { %v2138_v14 = vpop.eup %2137  ;;  %v1466_v2 = vmul.f32 1.442695, %v3099_v46  ;;  %v1434_v37 = vmul.f32 1.442695, %v3102_v12 }
 0x2b5   : > { %1528 = vadd.xlane.f32.xlu0 %v2138_v14 }
 0x2b6   : > { %2139 = vpow2.f32 %v1466_v2 }
 0x2b7   : > { %2141 = vpow2.f32 %v1434_v37 }
 0x2b9   : > { %v1341_v60 = vpop.xlane.xlu2 %1340  ;;  %v1373_v20 = vpop.xlane.xlu0 %1372 }
 0x2ba   : > { %v3107_v22 = vsub.f32 %v2979_v49, %v1341_v60  ;;  %v3110_v23 = vsub.f32 %v2982_v50, %v1373_v20 }
 0x2bc   : > { %v2140_v40 = vpop.eup %2139  ;;  %v1436_v39 = vmul.f32 1.442695, %v3107_v22  ;;  %v1468_v24 = vmul.f32 1.442695, %v3110_v23 }
 0x2bd   : > { %v2142_v26 = vpop.eup %2141  ;;  %1530 = vadd.xlane.f32.xlu1 %v2140_v40 }
 0x2be   : > { %2143 = vpow2.f32 %v1436_v39  ;;  %1498 = vadd.xlane.f32.xlu0 %v2142_v26 }
 0x2bf   : > { %2145 = vpow2.f32 %v1468_v24 }
 0x2c1   : > { %v1375_v28 = vpop.xlane.xlu1 %1374  ;;  %v1343_v30 = vpop.xlane.xlu0 %1342 }
 0x2c2   : > { %v3115_v31 = vsub.f32 %v2990_v53, %v1375_v28  ;;  %v3118_v49 = vsub.f32 %v2987_v41, %v1343_v30 }
 0x2c4   : > { %v2144_v50 = vpop.eup %2143  ;;  %v1470_v34 = vmul.f32 1.442695, %v3115_v31  ;;  %v1438_v32 = vmul.f32 1.442695, %v3118_v49 }
 0x2c5   : > { %v2146_v35 = vpop.eup %2145  ;;  %1500 = vadd.xlane.f32.xlu1 %v2144_v50 }
 0x2c6   : > { %2147 = vpow2.f32 %v1470_v34  ;;  %1532 = vadd.xlane.f32.xlu2 %v2146_v35 }
 0x2c7   : > { %2149 = vpow2.f32 %v1438_v32 }
 0x2c9   : > { %v1377_v1 = vpop.xlane.xlu2 %1376  ;;  %v1345_v38 = vpop.xlane.xlu1 %1344 }
 0x2ca   : > { %v3123_v9 = vsub.f32 %v2998_v56, %v1377_v1  ;;  %v3126_v53 = vsub.f32 %v2995_v54, %v1345_v38 }
 0x2cc   : > { %v2148_v41 = vpop.eup %2147  ;;  %v1472_v47 = vmul.f32 1.442695, %v3123_v9  ;;  %v1440_v33 = vmul.f32 1.442695, %v3126_v53 }
 0x2cd   : > { %v2150_v52 = vpop.eup %2149  ;;  %1534 = vadd.xlane.f32.xlu0 %v2148_v41 }
 0x2ce   : > { %2151 = vpow2.f32 %v1472_v47  ;;  %1502 = vadd.xlane.f32.xlu2 %v2150_v52 }
 0x2cf   : > { %2153 = vpow2.f32 %v1440_v33 }
 0x2d1   : > { %v1347_v58 = vpop.xlane.xlu2 %1346  ;;  %v3130_v18 = vpop.xlane.xlu0 %1378 }
 0x2d2   : > { %v3133_v63 = vsub.f32 %v3003_v61, %v1347_v58 }
 0x2d4   : > { %v2152_v56 = vpop.eup %2151  ;;  %v1442_v54 = vmul.f32 1.442695, %v3133_v63 }
 0x2d5   : > { %v2154_v5 = vpop.eup %2153  ;;  %1536 = vadd.xlane.f32.xlu1 %v2152_v56 }
 0x2d6   : > { %2155 = vpow2.f32 %v1442_v54  ;;  %1504 = vadd.xlane.f32.xlu0 %v2154_v5 }
 0x2d9   : > { %v3136_v57 = vpop.xlane.xlu1 %1380  ;;  %v1349_v15 = vpop.xlane.xlu0 %1348 }
 0x2da   : > { %v3139_v44 = vsub.f32 %v3015_v6, %v1349_v15 }
 0x2dc   : > { %v2156_v11 = vpop.eup %2155  ;;  %v1444_v48 = vmul.f32 1.442695, %v3139_v44 }
 0x2dd   : > { %1506 = vadd.xlane.f32.xlu1 %v2156_v11 }
 0x2de   : > { %2157 = vpow2.f32 %v1444_v48 }
 0x2e1   : > { %v3142_v61 = vpop.xlane.xlu2 %1382  ;;  %v1351_v14 = vpop.xlane.xlu1 %1350 }
 0x2e2   : > { %v3145_v2 = vsub.f32 %v3027_v13, %v1351_v14  ;;  %v1481_v37 = vpop.xlane.xlu0 %1480 }
 0x2e3   : > { %2159 = vlog2.f32 %v1481_v37 }
 0x2e4   : > { %v1446_v60 = vmul.f32 1.442695, %v3145_v2  ;;  %v2158_v20 = vpop.eup %2157 }
 0x2e5   : > { %1508 = vadd.xlane.f32.xlu2 %v2158_v20 }
 0x2e6   : > { %2161 = vpow2.f32 %v1446_v60 }
 0x2e9   : > { %v2160_v6 = vpop.eup %2159  ;;  %v1353_v40 = vpop.xlane.xlu2 %1352 }
 0x2ea   : > { %v1483_v39 = vpop.xlane.xlu1 %1482  ;;  %v1545_v24 = vmul.f32 0.6931472, %v2160_v6  ;;  %v3152_v26 = vsub.f32 %v3043_v21, %v1353_v40  ;;  %v1355_v13 = vpop.xlane.xlu0 %1354 }
 0x2eb   : > { %2163 = vlog2.f32 %v1483_v39  ;;  %v3155_v28 = vsub.f32 %v3046_v25, %v1355_v13 }
 0x2ec   : > { %v1608_v30 = vsub.f32 %v3011_v3, %v1545_v24  ;;  %v1448_v50 = vmul.f32 1.442695, %v3152_v26  ;;  %v2162_v34 = vpop.eup %2161 }
 0x2ed   : > { %v1450_v32 = vmul.f32 1.442695, %v3155_v28  ;;  %1510 = vadd.xlane.f32.xlu0 %v2162_v34  ;;  %v3188_v34 = vsub.f32 %v3018_v8, %v3136_v57 }
 0x2ee   : > { %1640 = vst [vmem:[%s3160_s17] sm:$0xff] %v1608_v30  ;;  %2165 = vpow2.f32 %v1448_v50 }
 0x2ef   : > { %2167 = vpow2.f32 %v1450_v32 }
 0x2f1   : > { %v2164_v21 = vpop.eup %2163  ;;  %v1485_v1 = vpop.xlane.xlu2 %1484 }
 0x2f2   : > { %v1547_v35 = vmul.f32 0.6931472, %v2164_v21  ;;  %v1357_v25 = vpop.xlane.xlu1 %1356  ;;  %2169 = vlog2.f32 %v1485_v1  ;;  %v1487_v38 = vpop.xlane.xlu0 %1486  ;;  %v1476_v21 = vmul.f32 1.442695, %v3188_v34 }
 0x2f3   : > { %v3164_v3 = vsub.f32 %v3055_v27, %v1357_v25  ;;  %2171 = vlog2.f32 %v1487_v38 }
 0x2f4   : > { %v1609_v41 = vsub.f32 %v3023_v10, %v1547_v35  ;;  %v2166_v47 = vpop.eup %2165 }
 0x2f5   : > { %v1452_v33 = vmul.f32 1.442695, %v3164_v3  ;;  %v2168_v52 = vpop.eup %2167  ;;  %1512 = vadd.xlane.f32.xlu1 %v2166_v47 }
 0x2f6   : > { %1641 = vst [vmem:[%s3160_s17 + $0x8] sm:$0xff] %v1609_v41  ;;  %1514 = vadd.xlane.f32.xlu2 %v2168_v52 }
 0x2f7   : > { %2173 = vpow2.f32 %v1452_v33 }
 0x2f8   : > { %v2170_v58 = vpop.eup %2169 }
 0x2f9   : > { %v2172_v56 = vpop.eup %2171  ;;  %v1549_v54 = vmul.f32 0.6931472, %v2170_v58  ;;  %v1359_v5 = vpop.xlane.xlu2 %1358 }
 0x2fa   : > { %v1489_v27 = vpop.xlane.xlu1 %1488  ;;  %v1551_v15 = vmul.f32 0.6931472, %v2172_v56  ;;  %v3170_v11 = vsub.f32 %v3067_v36, %v1359_v5  ;;  %v1361_v10 = vpop.xlane.xlu0 %1360 }
 0x2fb   : > { %2175 = vlog2.f32 %v1489_v27  ;;  %v1610_v48 = vsub.f32 %v3035_v7, %v1549_v54  ;;  %v3174_v14 = vsub.f32 %v3070_v42, %v1361_v10 }
 0x2fc   : > { %v1611_v60 = vsub.f32 %v3038_v17, %v1551_v15  ;;  %v1454_v20 = vmul.f32 1.442695, %v3170_v11 }
 0x2fd   : > { %v2174_v37 = vpop.eup %2173  ;;  %1642 = vst [vmem:[%s3160_s17 + $0x10] sm:$0xff] %v1610_v48  ;;  %v1456_v6 = vmul.f32 1.442695, %v3174_v14 }
 0x2fe   : > { %1516 = vadd.xlane.f32.xlu0 %v2174_v37  ;;  %1643 = vst [vmem:[%s3160_s17 + $0x18] sm:$0xff] %v1611_v60  ;;  %2177 = vpow2.f32 %v1454_v20 }
 0x2ff   : > { %2179 = vpow2.f32 %v1456_v6 }
 0x301   : > { %v2176_v36 = vpop.eup %2175  ;;  %v1491_v7 = vpop.xlane.xlu2 %1490 }
 0x302   : > { %v1553_v40 = vmul.f32 0.6931472, %v2176_v36  ;;  %v1363_v39 = vpop.xlane.xlu1 %1362  ;;  %2181 = vlog2.f32 %v1491_v7  ;;  %v1493_v24 = vpop.xlane.xlu0 %1492 }
 0x303   : > { %v3182_v42 = vsub.f32 %v3079_v51, %v1363_v39  ;;  %2183 = vlog2.f32 %v1493_v24 }
 0x304   : > { %v1612_v17 = vsub.f32 %v3050_v16, %v1553_v40  ;;  %v2178_v13 = vpop.eup %2177 }
 0x305   : > { %v1458_v30 = vmul.f32 1.442695, %v3182_v42  ;;  %v2180_v50 = vpop.eup %2179  ;;  %1518 = vadd.xlane.f32.xlu1 %v2178_v13 }
 0x306   : > { %1644 = vst [vmem:[%s3160_s17 + $0x20] sm:$0xff] %v1612_v17  ;;  %1520 = vadd.xlane.f32.xlu2 %v2180_v50 }
 0x307   : > { %2185 = vpow2.f32 %v1458_v30 }
 0x308   : > { %v2182_v32 = vpop.eup %2181 }
 0x309   : > { %v2184_v51 = vpop.eup %2183  ;;  %v1555_v35 = vmul.f32 0.6931472, %v2182_v32  ;;  %v1365_v1 = vpop.xlane.xlu2 %1364 }
 0x30a   : > { %v1495_v16 = vpop.xlane.xlu1 %1494  ;;  %v1557_v25 = vmul.f32 0.6931472, %v2184_v51  ;;  %v3193_v38 = vsub.f32 %v3087_v4, %v1365_v1  ;;  %v1367_v8 = vpop.xlane.xlu0 %1366  ;;  %v3205_v4 = vsub.f32 %v3030_v0, %v3142_v61 }
 0x30b   : > { %2187 = vlog2.f32 %v1495_v16  ;;  %v1613_v57 = vsub.f32 %v3059_v43, %v1555_v35  ;;  %v3197_v41 = vsub.f32 %v3090_v45, %v1367_v8  ;;  %v3210_v43 = vsub.f32 %v3006_v62, %v3130_v18 }
 0x30c   : > { %v1614_v33 = vsub.f32 %v3062_v19, %v1557_v25  ;;  %v1460_v52 = vmul.f32 1.442695, %v3193_v38  ;;  %2189 = vpow2.f32 %v1476_v21  ;;  %v1478_v54 = vmul.f32 1.442695, %v3205_v4 }
 0x30d   : > { %v2186_v47 = vpop.eup %2185  ;;  %1645 = vst [vmem:[%s3160_s17 + $0x28] sm:$0xff] %v1613_v57  ;;  %v1462_v58 = vmul.f32 1.442695, %v3197_v41  ;;  %v1474_v27 = vmul.f32 1.442695, %v3210_v43 }
 0x30e   : > { %1522 = vadd.xlane.f32.xlu0 %v2186_v47  ;;  %1646 = vst [vmem:[%s3160_s17 + $0x30] sm:$0xff] %v1614_v33  ;;  %2191 = vpow2.f32 %v1460_v52 }
 0x30f   : > { %2193 = vpow2.f32 %v1462_v58 }
 0x311   : > { %v2188_v19 = vpop.eup %2187  ;;  %v1497_v56 = vpop.xlane.xlu2 %1496 }
 0x312   : > { %v1559_v45 = vmul.f32 0.6931472, %v2188_v19  ;;  %2195 = vlog2.f32 %v1497_v56  ;;  %v2190_v5 = vpop.eup %2189 }
 0x313   : > { %2197 = vpow2.f32 %v1478_v54 }
 0x314   : > { %v1615_v0 = vsub.f32 %v3074_v29, %v1559_v45  ;;  %v2192_v61 = vpop.eup %2191  ;;  %2199 = vpow2.f32 %v1474_v27 }
 0x315   : > { %v2194_v15 = vpop.eup %2193  ;;  %1524 = vadd.xlane.f32.xlu1 %v2192_v61 }
 0x316   : > { %1647 = vst [vmem:[%s3160_s17 + $0x38] sm:$0xff] %v1615_v0  ;;  %1540 = vadd.xlane.f32.xlu0 %v2190_v5  ;;  %1526 = vadd.xlane.f32.xlu2 %v2194_v15 }
 0x318   : > { %v2196_v62 = vpop.eup %2195 }
 0x319   : > { %v1561_v18 = vmul.f32 0.6931472, %v2196_v62  ;;  %v2198_v48 = vpop.eup %2197 }
 0x31a   : > { %v2200_v37 = vpop.eup %2199 }
 0x31b   : > { %v1616_v10 = vsub.f32 %v3083_v59, %v1561_v18 }
 0x31d   : > { %1648 = vst [vmem:[%s3160_s17 + $0x40] sm:$0xff] %v1616_v10  ;;  %1542 = vadd.xlane.f32.xlu1 %v2198_v48 }
 0x31e   : > { %1538 = vadd.xlane.f32.xlu2 %v2200_v37 }
 0x328   : > { %v1529_v60 = vpop.xlane.xlu0 %1528 }
 0x329   : > { %2201 = vlog2.f32 %v1529_v60 }
 0x32f   : > { %v2202_v29 = vpop.eup %2201 }
 0x330   : > { %v1593_v20 = vmul.f32 0.6931472, %v2202_v29  ;;  %v1531_v6 = vpop.xlane.xlu1 %1530 }
 0x331   : > { %2203 = vlog2.f32 %v1531_v6  ;;  %v1499_v36 = vpop.xlane.xlu0 %1498 }
 0x332   : > { %v1632_v40 = vsub.f32 %v3095_v55, %v1593_v20  ;;  %2205 = vlog2.f32 %v1499_v36 }
 0x334   : > { %1664 = vst [vmem:[%s3160_s17 + $0xc0] sm:$0xff] %v1632_v40 }
 0x337   : > { %v2204_v39 = vpop.eup %2203 }
 0x338   : > { %v2206_v59 = vpop.eup %2205  ;;  %v1595_v7 = vmul.f32 0.6931472, %v2204_v39  ;;  %v1501_v24 = vpop.xlane.xlu1 %1500 }
 0x339   : > { %v1563_v17 = vmul.f32 0.6931472, %v2206_v59  ;;  %2207 = vlog2.f32 %v1501_v24  ;;  %v1533_v13 = vpop.xlane.xlu2 %1532 }
 0x33a   : > { %v1633_v30 = vsub.f32 %v3099_v46, %v1595_v7  ;;  %2209 = vlog2.f32 %v1533_v13 }
 0x33b   : > { %v1617_v50 = vsub.f32 %v3102_v12, %v1563_v17 }
 0x33c   : > { %1665 = vst [vmem:[%s3160_s17 + $0xc8] sm:$0xff] %v1633_v30 }
 0x33d   : > { %1649 = vst [vmem:[%s3160_s17 + $0x48] sm:$0xff] %v1617_v50 }
 0x33f   : > { %v2208_v32 = vpop.eup %2207 }
 0x340   : > { %v2210_v55 = vpop.eup %2209  ;;  %v1565_v51 = vmul.f32 0.6931472, %v2208_v32  ;;  %v1535_v21 = vpop.xlane.xlu0 %1534 }
 0x341   : > { %v1597_v35 = vmul.f32 0.6931472, %v2210_v55  ;;  %v1503_v16 = vpop.xlane.xlu2 %1502  ;;  %2211 = vlog2.f32 %v1535_v21 }
 0x342   : > { %v1618_v1 = vsub.f32 %v3107_v22, %v1565_v51  ;;  %2213 = vlog2.f32 %v1503_v16 }
 0x343   : > { %v1634_v46 = vsub.f32 %v3110_v23, %v1597_v35 }
 0x344   : > { %1650 = vst [vmem:[%s3160_s17 + $0x50] sm:$0xff] %v1618_v1 }
 0x345   : > { %1666 = vst [vmem:[%s3160_s17 + $0xd0] sm:$0xff] %v1634_v46 }
 0x347   : > { %v2212_v25 = vpop.eup %2211 }
 0x348   : > { %v2214_v12 = vpop.eup %2213  ;;  %v1599_v8 = vmul.f32 0.6931472, %v2212_v25  ;;  %v1537_v57 = vpop.xlane.xlu1 %1536 }
 0x349   : > { %v1567_v47 = vmul.f32 0.6931472, %v2214_v12  ;;  %2215 = vlog2.f32 %v1537_v57  ;;  %v1505_v33 = vpop.xlane.xlu0 %1504 }
 0x34a   : > { %v1635_v52 = vsub.f32 %v3115_v31, %v1599_v8  ;;  %2217 = vlog2.f32 %v1505_v33 }
 0x34b   : > { %v1619_v22 = vsub.f32 %v3118_v49, %v1567_v47 }
 0x34c   : > { %1667 = vst [vmem:[%s3160_s17 + $0xd8] sm:$0xff] %v1635_v52 }
 0x34d   : > { %1651 = vst [vmem:[%s3160_s17 + $0x58] sm:$0xff] %v1619_v22 }
 0x34f   : > { %v2216_v23 = vpop.eup %2215 }
 0x350   : > { %v2218_v58 = vpop.eup %2217  ;;  %v1601_v19 = vmul.f32 0.6931472, %v2216_v23  ;;  %v1507_v45 = vpop.xlane.xlu1 %1506 }
 0x351   : > { %v1569_v56 = vmul.f32 0.6931472, %v2218_v58  ;;  %2219 = vlog2.f32 %v1507_v45 }
 0x352   : > { %v1636_v54 = vsub.f32 %v3123_v9, %v1601_v19 }
 0x353   : > { %v1620_v5 = vsub.f32 %v3126_v53, %v1569_v56 }
 0x354   : > { %1668 = vst [vmem:[%s3160_s17 + $0xe0] sm:$0xff] %v1636_v54 }
 0x355   : > { %1652 = vst [vmem:[%s3160_s17 + $0x60] sm:$0xff] %v1620_v5 }
 0x357   : > { %v2220_v31 = vpop.eup %2219 }
 0x358   : > { %v1571_v27 = vmul.f32 0.6931472, %v2220_v31  ;;  %v1509_v0 = vpop.xlane.xlu2 %1508 }
 0x359   : > { %2221 = vlog2.f32 %v1509_v0 }
 0x35a   : > { %v1621_v49 = vsub.f32 %v3133_v63, %v1571_v27 }
 0x35c   : > { %1653 = vst [vmem:[%s3160_s17 + $0x68] sm:$0xff] %v1621_v49 }
 0x35f   : > { %v2222_v61 = vpop.eup %2221 }
 0x360   : > { %v1573_v15 = vmul.f32 0.6931472, %v2222_v61  ;;  %v1511_v62 = vpop.xlane.xlu0 %1510 }
 0x361   : > { %2223 = vlog2.f32 %v1511_v62 }
 0x362   : > { %v1622_v18 = vsub.f32 %v3139_v44, %v1573_v15 }
 0x364   : > { %1654 = vst [vmem:[%s3160_s17 + $0x70] sm:$0xff] %v1622_v18 }
 0x367   : > { %v2224_v9 = vpop.eup %2223 }
 0x368   : > { %v1513_v53 = vpop.xlane.xlu1 %1512  ;;  %v1575_v10 = vmul.f32 0.6931472, %v2224_v9 }
 0x369   : > { %2225 = vlog2.f32 %v1513_v53  ;;  %v1515_v48 = vpop.xlane.xlu2 %1514 }
 0x36a   : > { %2227 = vlog2.f32 %v1515_v48  ;;  %v1623_v63 = vsub.f32 %v3145_v2, %v1575_v10 }
 0x36c   : > { %1655 = vst [vmem:[%s3160_s17 + $0x78] sm:$0xff] %v1623_v63 }
 0x36f   : > { %v2226_v37 = vpop.eup %2225 }
 0x370   : > { %v2228_v60 = vpop.eup %2227  ;;  %v1577_v29 = vmul.f32 0.6931472, %v2226_v37 }
 0x371   : > { %v1517_v20 = vpop.xlane.xlu0 %1516  ;;  %v1579_v6 = vmul.f32 0.6931472, %v2228_v60 }
 0x372   : > { %2229 = vlog2.f32 %v1517_v20  ;;  %v1624_v44 = vsub.f32 %v3152_v26, %v1577_v29 }
 0x373   : > { %v1625_v36 = vsub.f32 %v3155_v28, %v1579_v6 }
 0x374   : > { %1656 = vst [vmem:[%s3160_s17 + $0x80] sm:$0xff] %v1624_v44 }
 0x375   : > { %1657 = vst [vmem:[%s3160_s17 + $0x88] sm:$0xff] %v1625_v36 }
 0x378   : > { %v2230_v40 = vpop.eup %2229  ;;  %v1519_v59 = vpop.xlane.xlu1 %1518 }
 0x379   : > { %v1581_v39 = vmul.f32 0.6931472, %v2230_v40  ;;  %2231 = vlog2.f32 %v1519_v59  ;;  %v1521_v2 = vpop.xlane.xlu2 %1520 }
 0x37a   : > { %2233 = vlog2.f32 %v1521_v2 }
 0x37b   : > { %v1626_v7 = vsub.f32 %v3164_v3, %v1581_v39 }
 0x37d   : > { %1658 = vst [vmem:[%s3160_s17 + $0x90] sm:$0xff] %v1626_v7 }
 0x37f   : > { %v2232_v24 = vpop.eup %2231 }
 0x380   : > { %v2234_v17 = vpop.eup %2233  ;;  %v1583_v13 = vmul.f32 0.6931472, %v2232_v24 }
 0x381   : > { %v1523_v30 = vpop.xlane.xlu0 %1522  ;;  %v1585_v26 = vmul.f32 0.6931472, %v2234_v17 }
 0x382   : > { %2235 = vlog2.f32 %v1523_v30  ;;  %v1627_v28 = vsub.f32 %v3170_v11, %v1583_v13 }
 0x383   : > { %v1628_v50 = vsub.f32 %v3174_v14, %v1585_v26 }
 0x384   : > { %1659 = vst [vmem:[%s3160_s17 + $0x98] sm:$0xff] %v1627_v28 }
 0x385   : > { %1660 = vst [vmem:[%s3160_s17 + $0xa0] sm:$0xff] %v1628_v50 }
 0x388   : > { %v2236_v32 = vpop.eup %2235  ;;  %v1525_v51 = vpop.xlane.xlu1 %1524 }
 0x389   : > { %v1587_v55 = vmul.f32 0.6931472, %v2236_v32  ;;  %v1541_v3 = vpop.xlane.xlu0 %1540  ;;  %2237 = vlog2.f32 %v1525_v51  ;;  %v1527_v21 = vpop.xlane.xlu2 %1526 }
 0x38a   : > { %2239 = vlog2.f32 %v1527_v21 }
 0x38b   : > { %v1629_v35 = vsub.f32 %v3182_v42, %v1587_v55  ;;  %2241 = vlog2.f32 %v1541_v3 }
 0x38d   : > { %1661 = vst [vmem:[%s3160_s17 + $0xa8] sm:$0xff] %v1629_v35 }
 0x38f   : > { %v2238_v16 = vpop.eup %2237 }
 0x390   : > { %v2240_v11 = vpop.eup %2239  ;;  %v1589_v14 = vmul.f32 0.6931472, %v2238_v16  ;;  %v1543_v1 = vpop.xlane.xlu1 %1542 }
 0x391   : > { %v2242_v46 = vpop.eup %2241  ;;  %v1591_v25 = vmul.f32 0.6931472, %v2240_v11  ;;  %2243 = vlog2.f32 %v1543_v1  ;;  %v1539_v12 = vpop.xlane.xlu2 %1538 }
 0x392   : > { %v1630_v8 = vsub.f32 %v3193_v38, %v1589_v14  ;;  %v1605_v57 = vmul.f32 0.6931472, %v2242_v46  ;;  %2245 = vlog2.f32 %v1539_v12 }
 0x393   : > { %v1631_v42 = vsub.f32 %v3197_v41, %v1591_v25 }
 0x394   : > { %1662 = vst [vmem:[%s3160_s17 + $0xb0] sm:$0xff] %v1630_v8  ;;  %v1638_v47 = vsub.f32 %v3188_v34, %v1605_v57 }
 0x395   : > { %1663 = vst [vmem:[%s3160_s17 + $0xb8] sm:$0xff] %v1631_v42 }
 0x396   : > { %1670 = vst [vmem:[%s3160_s17 + $0xf0] sm:$0xff] %v1638_v47 }
 0x397   : > { %v2244_v33 = vpop.eup %2243 }
 0x398   : > { %v2246_v38 = vpop.eup %2245  ;;  %v1607_v52 = vmul.f32 0.6931472, %v2244_v33 }
 0x399   : > { %v1603_v22 = vmul.f32 0.6931472, %v2246_v38 }
 0x39a   : > { %v1639_v41 = vsub.f32 %v3205_v4, %v1607_v52 }
 0x39b   : > { %v1637_v34 = vsub.f32 %v3210_v43, %v1603_v22 }
 0x39c   : > { %1671 = vst [vmem:[%s3160_s17 + $0xf8] sm:$0xff] %v1639_v41 }
 0x39d   : > { %1669 = vst [vmem:[%s3160_s17 + $0xe8] sm:$0xff] %v1637_v34 }
 0x39e   : > { %2274 = shalt.err (!%p2271_p3)
}
 0x39f   : > { %s2314_s15 = smov 128   ;;  %s2315_s16 = smov 8  }
 0x3a0   : > { %2035 = dma.vmem_to_hbm [thread:$0]  (%p2384_p5), %s1686_s22, 4096, %s1688_s6, %s1673_s7, %s2314_s15, %s2314_s15, %s2315_s16  }
 0x3a1 PF: > { %p2041_p4 = scmp.ge.s32.totalorder %s2309_s21, 2  ;;  %s1702_s17 = sand.u32 1, %s2297_s18  }
 0x3a2   : > { %s1703_s23 = scalar_lea.sflag [#allocation3], %s1702_s17 }
 0x3a3   : > { %p2038_p7 = pnand %p2041_p4, %p2388_p6 }
 0x3a5   : > { %p2039_p8 = pneg %p2038_p7 }
 0x3a7   : > { %2292 = dma.done.wait (%p2039_p8), %s1703_s23, 4096  }
 0x3a8   : > { %2294 = vsyncadd (%p2039_p8), %s1703_s23, 4294963200  ;;  %p15_p9 = scmp.ge.s32.totalorder %s2371_s24, 4   ;;  %s3352_s18 = smov %s2301_s19 }
 0x3a9   : > { %s3353_s19 = smov %s2305_s20  ;;  %s3354_s20 = smov %s2382_s27 }
 0x3aa   : > { %s3355_s21 = smov %s2371_s24  ;;  %17 = sbr.rel (!%p15_p9) target bundleno = 3 (0x3), region = 75 }
 0x3af   :  { %1709 = vsyncpa [#allocation3], 1 }
 0x3b0   :  { %1711 = vsyncpa [#allocation3 + $0x1], 1 }

</bundles_post_ra>
